<compile_context>
chip_gen: v6e
topology: v6e:2x2x1
jax: 0.10.0
libtpu: 0.0.40
codegen_flags: <defaults>
</compile_context>

<pallas_src>
import math

import jax
import jax.numpy as jnp
from jax.experimental import pallas as pl
from jax.experimental.pallas import tpu as pltpu


# --------------------------- fused forward kernel ----------------------------
def _make_fused_lstm_reg_kernel(num_layers, seq_len, batch, hidden):
    """num_layers LSTM layers + Linear head, all VMEM-resident, no grid."""
    S, B, H = seq_len, batch, hidden

    def kernel(*refs):
        x_ref = refs[0]                                       # (S*B, I)
        layer_refs = [refs[1 + 3 * l: 1 + 3 * (l + 1)] for l in range(num_layers)]
        w_reg_t_ref = refs[1 + 3 * num_layers]                # (H, O)
        b_reg_ref = refs[2 + 3 * num_layers]                  # (1, O)
        out_ref = refs[3 + 3 * num_layers]                    # (S*B, O)
        y_ref = refs[4 + 3 * num_layers]                      # (S*B, H) scratch

        cur = x_ref[...]                                      # layer input, (S*B, in)
        for wih_t_ref, whh_t_ref, b_ref in layer_refs:
            # Hoisted, MXU-friendly input projection for all timesteps at once,
            # with the combined bias (b_ih + b_hh) folded in.
            proj = (
                jnp.dot(cur, wih_t_ref[...], preferred_element_type=jnp.float32)
                + b_ref[...]
            )                                                 # (S*B, 4H)
            whh_t = whh_t_ref[...]                            # (H, 4H), loaded once

            h = jnp.zeros((B, H), jnp.float32)
            c = jnp.zeros((B, H), jnp.float32)
            for t in range(S):                                # static, fully unrolled
                gates = proj[t * B:(t + 1) * B, :] + jnp.dot(
                    h, whh_t, preferred_element_type=jnp.float32)     # (B, 4H)
                sg = jax.nn.sigmoid(gates)                    # one full-width pass
                tg = jnp.tanh(gates)                          # one full-width pass
                i_g = sg[:, 0 * H:1 * H]
                f_g = sg[:, 1 * H:2 * H]
                g_g = tg[:, 2 * H:3 * H]
                o_g = sg[:, 3 * H:4 * H]
                c = f_g * c + i_g * g_g
                h = o_g * jnp.tanh(c)
                y_ref[t * B:(t + 1) * B, :] = h               # static-slice store
            cur = y_ref[...]                                  # (S*B, H) -> next layer

        # Fused regression head: one (S*B, H) @ (H, O) matmul + bias.
        out_ref[...] = (
            jnp.dot(cur, w_reg_t_ref[...], preferred_element_type=jnp.float32)
            + b_reg_ref[...]
        ).astype(out_ref.dtype)

    return kernel


def lstm_reg_forward(x, params):
    """Equivalent of lstm_reg.forward (inference/eval semantics).

    x: (seq_len, batch, input_size) float32 — nn.LSTM default (seq-first) layout.
    """
    # TODO(synk): nn.LSTM's dropout=0.15 between layers only applies in training
    # mode; this forward reproduces inference/eval semantics (no dropout).
    S, B, I = x.shape
    layers = params["lstm"]
    num_layers = len(layers)
    H = layers[0][1].shape[0]
    O = params["w_reg_t"].shape[1]

    flat_inputs = [x.reshape(S * B, I)]
    in_specs = [pl.BlockSpec((S * B, I), lambda: (0, 0))]
    for (wih_t, whh_t, bias) in layers:
        flat_inputs += [wih_t, whh_t, bias]
        in_specs += [
            pl.BlockSpec(wih_t.shape, lambda: (0, 0)),
            pl.BlockSpec(whh_t.shape, lambda: (0, 0)),
            pl.BlockSpec(bias.shape, lambda: (0, 0)),
        ]
    flat_inputs += [params["w_reg_t"], params["b_reg"]]
    in_specs += [
        pl.BlockSpec(params["w_reg_t"].shape, lambda: (0, 0)),
        pl.BlockSpec(params["b_reg"].shape, lambda: (0, 0)),
    ]

    kernel = _make_fused_lstm_reg_kernel(num_layers, S, B, H)

    out2d = pl.pallas_call(
        kernel,
        out_shape=jax.ShapeDtypeStruct((S * B, O), x.dtype),
        in_specs=in_specs,
        out_specs=pl.BlockSpec((S * B, O), lambda: (0, 0)),
        scratch_shapes=[pltpu.VMEM((S * B, H), jnp.float32)],   # layer outputs
    )(*flat_inputs)
    return out2d.reshape(S, B, O)


# ------------------------------ parameter init -------------------------------
def init_params(key, input_size, hidden_size, num_layers, output_size=1):
    """Deterministic init mimicking PyTorch's U(-1/sqrt(H), 1/sqrt(H))."""
    params = {"lstm": []}
    k = 1.0 / math.sqrt(hidden_size)
    for layer in range(num_layers):
        in_l = input_size if layer == 0 else hidden_size
        key, k1, k2, k3, k4 = jax.random.split(key, 5)
        w_ih = jax.random.uniform(k1, (4 * hidden_size, in_l), jnp.float32, -k, k)
        w_hh = jax.random.uniform(k2, (4 * hidden_size, hidden_size), jnp.float32, -k, k)
        b_ih = jax.random.uniform(k3, (4 * hidden_size,), jnp.float32, -k, k)
        b_hh = jax.random.uniform(k4, (4 * hidden_size,), jnp.float32, -k, k)
        params["lstm"].append(
            (w_ih.T, w_hh.T, (b_ih + b_hh).reshape(1, 4 * hidden_size))
        )
    key, k5, k6 = jax.random.split(key, 3)
    kr = 1.0 / math.sqrt(hidden_size)
    w_reg = jax.random.uniform(k5, (output_size, hidden_size), jnp.float32, -kr, kr)
    b_reg = jax.random.uniform(k6, (output_size,), jnp.float32, -kr, kr)
    params["w_reg_t"] = w_reg.T
    params["b_reg"] = b_reg.reshape(1, output_size)
    return params


# ------------------------------------ main ------------------------------------
if __name__ == "__main__":
    input_size, hidden_size, num_layers, output_size = 4, 32, 2, 1
    seq_len, batch = 8, 2

    key = jax.random.PRNGKey(0)
    key, kx = jax.random.split(key)
    x = jax.random.normal(kx, (seq_len, batch, input_size), dtype=jnp.float32)

    params = init_params(key, input_size, hidden_size, num_layers, output_size)

    out = lstm_reg_forward(x, params)
    out = jax.block_until_ready(out)
    assert out.shape == (seq_len, batch, output_size), out.shape
    print("KERNEL_OK")
</pallas_src>

<mosaic_0001>
module attributes {stable_mosaic.version = 11 : i64} {
  func.func @kernel(%arg0: memref<16x4xf32, #tpu.memory_space<vmem>>, %arg1: memref<4x128xf32, #tpu.memory_space<vmem>>, %arg2: memref<32x128xf32, #tpu.memory_space<vmem>>, %arg3: memref<1x128xf32, #tpu.memory_space<vmem>>, %arg4: memref<32x128xf32, #tpu.memory_space<vmem>>, %arg5: memref<32x128xf32, #tpu.memory_space<vmem>>, %arg6: memref<1x128xf32, #tpu.memory_space<vmem>>, %arg7: memref<32x1xf32, #tpu.memory_space<vmem>>, %arg8: memref<1x1xf32, #tpu.memory_space<vmem>>, %arg9: memref<16x1xf32, #tpu.memory_space<vmem>>, %arg10: memref<16x32xf32, #tpu.memory_space<vmem>>) attributes {dimension_semantics = [], scalar_prefetch = 0 : i64, scratch_operands = 1 : i64, tpu.core_type = #tpu.core_type<tc>} {
    %c0 = arith.constant 0 : index
    %c0_0 = arith.constant 0 : index
    %0 = vector.load %arg0[%c0, %c0_0] : memref<16x4xf32, #tpu.memory_space<vmem>>, vector<16x4xf32>
    %c0_1 = arith.constant 0 : index
    %c0_2 = arith.constant 0 : index
    %1 = vector.load %arg1[%c0_1, %c0_2] : memref<4x128xf32, #tpu.memory_space<vmem>>, vector<4x128xf32>
    %cst = arith.constant dense<0.000000e+00> : vector<16x128xf32>
    %2 = tpu.matmul %0, %1, %cst {dimension_numbers = #tpu.dot_dimension_numbers<[1], [0], [0], [1], [0, 0, 1, 1], [], []>} : vector<16x4xf32>, vector<4x128xf32>, vector<16x128xf32> -> vector<16x128xf32>
    %c0_3 = arith.constant 0 : index
    %c0_4 = arith.constant 0 : index
    %3 = vector.load %arg3[%c0_3, %c0_4] : memref<1x128xf32, #tpu.memory_space<vmem>>, vector<1x128xf32>
    %4 = vector.broadcast %3 : vector<1x128xf32> to vector<16x128xf32>
    %5 = arith.addf %2, %4 : vector<16x128xf32>
    %c0_5 = arith.constant 0 : index
    %c0_6 = arith.constant 0 : index
    %6 = vector.load %arg2[%c0_5, %c0_6] : memref<32x128xf32, #tpu.memory_space<vmem>>, vector<32x128xf32>
    %cst_7 = arith.constant 0.000000e+00 : f32
    %7 = vector.broadcast %cst_7 : f32 to vector<2x32xf32>
    %cst_8 = arith.constant 0.000000e+00 : f32
    %8 = vector.broadcast %cst_8 : f32 to vector<2x32xf32>
    %9 = vector.extract_strided_slice %5 {offsets = [0, 0], sizes = [2, 128], strides = [1, 1]} : vector<16x128xf32> to vector<2x128xf32>
    %cst_9 = arith.constant dense<0.000000e+00> : vector<2x128xf32>
    %10 = tpu.matmul %7, %6, %cst_9 {dimension_numbers = #tpu.dot_dimension_numbers<[1], [0], [0], [1], [0, 0, 1, 1], [], []>} : vector<2x32xf32>, vector<32x128xf32>, vector<2x128xf32> -> vector<2x128xf32>
    %11 = arith.addf %9, %10 : vector<2x128xf32>
    %12 = arith.negf %11 : vector<2x128xf32>
    %13 = math.exp %12 : vector<2x128xf32>
    %cst_10 = arith.constant 1.000000e+00 : f32
    %14 = vector.broadcast %cst_10 : f32 to vector<2x128xf32>
    %15 = arith.addf %14, %13 : vector<2x128xf32>
    %16 = arith.divf %14, %15 : vector<2x128xf32>
    %17 = math.tanh %11 : vector<2x128xf32>
    %18 = vector.extract_strided_slice %16 {offsets = [0, 0], sizes = [2, 32], strides = [1, 1]} : vector<2x128xf32> to vector<2x32xf32>
    %19 = vector.extract_strided_slice %16 {offsets = [0, 32], sizes = [2, 32], strides = [1, 1]} : vector<2x128xf32> to vector<2x32xf32>
    %20 = vector.extract_strided_slice %17 {offsets = [0, 64], sizes = [2, 32], strides = [1, 1]} : vector<2x128xf32> to vector<2x32xf32>
    %21 = vector.extract_strided_slice %16 {offsets = [0, 96], sizes = [2, 32], strides = [1, 1]} : vector<2x128xf32> to vector<2x32xf32>
    %22 = arith.mulf %19, %8 : vector<2x32xf32>
    %23 = arith.mulf %18, %20 : vector<2x32xf32>
    %24 = arith.addf %22, %23 : vector<2x32xf32>
    %25 = math.tanh %24 : vector<2x32xf32>
    %26 = arith.mulf %21, %25 : vector<2x32xf32>
    %c0_11 = arith.constant 0 : index
    %c0_12 = arith.constant 0 : index
    %27 = vector.load %arg10[%c0_11, %c0_12] : memref<16x32xf32, #tpu.memory_space<vmem>>, vector<2x32xf32>
    tpu.vector_store %arg10[%c0_11, %c0_12], %26 {strides = array<i32>} : memref<16x32xf32, #tpu.memory_space<vmem>>, vector<2x32xf32>,
    %28 = vector.extract_strided_slice %5 {offsets = [2, 0], sizes = [2, 128], strides = [1, 1]} : vector<16x128xf32> to vector<2x128xf32>
    %cst_13 = arith.constant dense<0.000000e+00> : vector<2x128xf32>
    %29 = tpu.matmul %26, %6, %cst_13 {dimension_numbers = #tpu.dot_dimension_numbers<[1], [0], [0], [1], [0, 0, 1, 1], [], []>} : vector<2x32xf32>, vector<32x128xf32>, vector<2x128xf32> -> vector<2x128xf32>
    %30 = arith.addf %28, %29 : vector<2x128xf32>
    %31 = arith.negf %30 : vector<2x128xf32>
    %32 = math.exp %31 : vector<2x128xf32>
    %cst_14 = arith.constant 1.000000e+00 : f32
    %33 = vector.broadcast %cst_14 : f32 to vector<2x128xf32>
    %34 = arith.addf %33, %32 : vector<2x128xf32>
    %35 = arith.divf %33, %34 : vector<2x128xf32>
    %36 = math.tanh %30 : vector<2x128xf32>
    %37 = vector.extract_strided_slice %35 {offsets = [0, 0], sizes = [2, 32], strides = [1, 1]} : vector<2x128xf32> to vector<2x32xf32>
    %38 = vector.extract_strided_slice %35 {offsets = [0, 32], sizes = [2, 32], strides = [1, 1]} : vector<2x128xf32> to vector<2x32xf32>
    %39 = vector.extract_strided_slice %36 {offsets = [0, 64], sizes = [2, 32], strides = [1, 1]} : vector<2x128xf32> to vector<2x32xf32>
    %40 = vector.extract_strided_slice %35 {offsets = [0, 96], sizes = [2, 32], strides = [1, 1]} : vector<2x128xf32> to vector<2x32xf32>
    %41 = arith.mulf %38, %24 : vector<2x32xf32>
    %42 = arith.mulf %37, %39 : vector<2x32xf32>
    %43 = arith.addf %41, %42 : vector<2x32xf32>
    %44 = math.tanh %43 : vector<2x32xf32>
    %45 = arith.mulf %40, %44 : vector<2x32xf32>
    %c2 = arith.constant 2 : index
    %c0_15 = arith.constant 0 : index
    %46 = vector.load %arg10[%c2, %c0_15] : memref<16x32xf32, #tpu.memory_space<vmem>>, vector<2x32xf32>
    tpu.vector_store %arg10[%c2, %c0_15], %45 {strides = array<i32>} : memref<16x32xf32, #tpu.memory_space<vmem>>, vector<2x32xf32>,
    %47 = vector.extract_strided_slice %5 {offsets = [4, 0], sizes = [2, 128], strides = [1, 1]} : vector<16x128xf32> to vector<2x128xf32>
    %cst_16 = arith.constant dense<0.000000e+00> : vector<2x128xf32>
    %48 = tpu.matmul %45, %6, %cst_16 {dimension_numbers = #tpu.dot_dimension_numbers<[1], [0], [0], [1], [0, 0, 1, 1], [], []>} : vector<2x32xf32>, vector<32x128xf32>, vector<2x128xf32> -> vector<2x128xf32>
    %49 = arith.addf %47, %48 : vector<2x128xf32>
    %50 = arith.negf %49 : vector<2x128xf32>
    %51 = math.exp %50 : vector<2x128xf32>
    %cst_17 = arith.constant 1.000000e+00 : f32
    %52 = vector.broadcast %cst_17 : f32 to vector<2x128xf32>
    %53 = arith.addf %52, %51 : vector<2x128xf32>
    %54 = arith.divf %52, %53 : vector<2x128xf32>
    %55 = math.tanh %49 : vector<2x128xf32>
    %56 = vector.extract_strided_slice %54 {offsets = [0, 0], sizes = [2, 32], strides = [1, 1]} : vector<2x128xf32> to vector<2x32xf32>
    %57 = vector.extract_strided_slice %54 {offsets = [0, 32], sizes = [2, 32], strides = [1, 1]} : vector<2x128xf32> to vector<2x32xf32>
    %58 = vector.extract_strided_slice %55 {offsets = [0, 64], sizes = [2, 32], strides = [1, 1]} : vector<2x128xf32> to vector<2x32xf32>
    %59 = vector.extract_strided_slice %54 {offsets = [0, 96], sizes = [2, 32], strides = [1, 1]} : vector<2x128xf32> to vector<2x32xf32>
    %60 = arith.mulf %57, %43 : vector<2x32xf32>
    %61 = arith.mulf %56, %58 : vector<2x32xf32>
    %62 = arith.addf %60, %61 : vector<2x32xf32>
    %63 = math.tanh %62 : vector<2x32xf32>
    %64 = arith.mulf %59, %63 : vector<2x32xf32>
    %c4 = arith.constant 4 : index
    %c0_18 = arith.constant 0 : index
    %65 = vector.load %arg10[%c4, %c0_18] : memref<16x32xf32, #tpu.memory_space<vmem>>, vector<2x32xf32>
    tpu.vector_store %arg10[%c4, %c0_18], %64 {strides = array<i32>} : memref<16x32xf32, #tpu.memory_space<vmem>>, vector<2x32xf32>,
    %66 = vector.extract_strided_slice %5 {offsets = [6, 0], sizes = [2, 128], strides = [1, 1]} : vector<16x128xf32> to vector<2x128xf32>
    %cst_19 = arith.constant dense<0.000000e+00> : vector<2x128xf32>
    %67 = tpu.matmul %64, %6, %cst_19 {dimension_numbers = #tpu.dot_dimension_numbers<[1], [0], [0], [1], [0, 0, 1, 1], [], []>} : vector<2x32xf32>, vector<32x128xf32>, vector<2x128xf32> -> vector<2x128xf32>
    %68 = arith.addf %66, %67 : vector<2x128xf32>
    %69 = arith.negf %68 : vector<2x128xf32>
    %70 = math.exp %69 : vector<2x128xf32>
    %cst_20 = arith.constant 1.000000e+00 : f32
    %71 = vector.broadcast %cst_20 : f32 to vector<2x128xf32>
    %72 = arith.addf %71, %70 : vector<2x128xf32>
    %73 = arith.divf %71, %72 : vector<2x128xf32>
    %74 = math.tanh %68 : vector<2x128xf32>
    %75 = vector.extract_strided_slice %73 {offsets = [0, 0], sizes = [2, 32], strides = [1, 1]} : vector<2x128xf32> to vector<2x32xf32>
    %76 = vector.extract_strided_slice %73 {offsets = [0, 32], sizes = [2, 32], strides = [1, 1]} : vector<2x128xf32> to vector<2x32xf32>
    %77 = vector.extract_strided_slice %74 {offsets = [0, 64], sizes = [2, 32], strides = [1, 1]} : vector<2x128xf32> to vector<2x32xf32>
    %78 = vector.extract_strided_slice %73 {offsets = [0, 96], sizes = [2, 32], strides = [1, 1]} : vector<2x128xf32> to vector<2x32xf32>
    %79 = arith.mulf %76, %62 : vector<2x32xf32>
    %80 = arith.mulf %75, %77 : vector<2x32xf32>
    %81 = arith.addf %79, %80 : vector<2x32xf32>
    %82 = math.tanh %81 : vector<2x32xf32>
    %83 = arith.mulf %78, %82 : vector<2x32xf32>
    %c6 = arith.constant 6 : index
    %c0_21 = arith.constant 0 : index
    %84 = vector.load %arg10[%c6, %c0_21] : memref<16x32xf32, #tpu.memory_space<vmem>>, vector<2x32xf32>
    tpu.vector_store %arg10[%c6, %c0_21], %83 {strides = array<i32>} : memref<16x32xf32, #tpu.memory_space<vmem>>, vector<2x32xf32>,
    %85 = vector.extract_strided_slice %5 {offsets = [8, 0], sizes = [2, 128], strides = [1, 1]} : vector<16x128xf32> to vector<2x128xf32>
    %cst_22 = arith.constant dense<0.000000e+00> : vector<2x128xf32>
    %86 = tpu.matmul %83, %6, %cst_22 {dimension_numbers = #tpu.dot_dimension_numbers<[1], [0], [0], [1], [0, 0, 1, 1], [], []>} : vector<2x32xf32>, vector<32x128xf32>, vector<2x128xf32> -> vector<2x128xf32>
    %87 = arith.addf %85, %86 : vector<2x128xf32>
    %88 = arith.negf %87 : vector<2x128xf32>
    %89 = math.exp %88 : vector<2x128xf32>
    %cst_23 = arith.constant 1.000000e+00 : f32
    %90 = vector.broadcast %cst_23 : f32 to vector<2x128xf32>
    %91 = arith.addf %90, %89 : vector<2x128xf32>
    %92 = arith.divf %90, %91 : vector<2x128xf32>
    %93 = math.tanh %87 : vector<2x128xf32>
    %94 = vector.extract_strided_slice %92 {offsets = [0, 0], sizes = [2, 32], strides = [1, 1]} : vector<2x128xf32> to vector<2x32xf32>
    %95 = vector.extract_strided_slice %92 {offsets = [0, 32], sizes = [2, 32], strides = [1, 1]} : vector<2x128xf32> to vector<2x32xf32>
    %96 = vector.extract_strided_slice %93 {offsets = [0, 64], sizes = [2, 32], strides = [1, 1]} : vector<2x128xf32> to vector<2x32xf32>
    %97 = vector.extract_strided_slice %92 {offsets = [0, 96], sizes = [2, 32], strides = [1, 1]} : vector<2x128xf32> to vector<2x32xf32>
    %98 = arith.mulf %95, %81 : vector<2x32xf32>
    %99 = arith.mulf %94, %96 : vector<2x32xf32>
    %100 = arith.addf %98, %99 : vector<2x32xf32>
    %101 = math.tanh %100 : vector<2x32xf32>
    %102 = arith.mulf %97, %101 : vector<2x32xf32>
    %c8 = arith.constant 8 : index
    %c0_24 = arith.constant 0 : index
    %103 = vector.load %arg10[%c8, %c0_24] : memref<16x32xf32, #tpu.memory_space<vmem>>, vector<2x32xf32>
    tpu.vector_store %arg10[%c8, %c0_24], %102 {strides = array<i32>} : memref<16x32xf32, #tpu.memory_space<vmem>>, vector<2x32xf32>,
    %104 = vector.extract_strided_slice %5 {offsets = [10, 0], sizes = [2, 128], strides = [1, 1]} : vector<16x128xf32> to vector<2x128xf32>
    %cst_25 = arith.constant dense<0.000000e+00> : vector<2x128xf32>
    %105 = tpu.matmul %102, %6, %cst_25 {dimension_numbers = #tpu.dot_dimension_numbers<[1], [0], [0], [1], [0, 0, 1, 1], [], []>} : vector<2x32xf32>, vector<32x128xf32>, vector<2x128xf32> -> vector<2x128xf32>
    %106 = arith.addf %104, %105 : vector<2x128xf32>
    %107 = arith.negf %106 : vector<2x128xf32>
    %108 = math.exp %107 : vector<2x128xf32>
    %cst_26 = arith.constant 1.000000e+00 : f32
    %109 = vector.broadcast %cst_26 : f32 to vector<2x128xf32>
    %110 = arith.addf %109, %108 : vector<2x128xf32>
    %111 = arith.divf %109, %110 : vector<2x128xf32>
    %112 = math.tanh %106 : vector<2x128xf32>
    %113 = vector.extract_strided_slice %111 {offsets = [0, 0], sizes = [2, 32], strides = [1, 1]} : vector<2x128xf32> to vector<2x32xf32>
    %114 = vector.extract_strided_slice %111 {offsets = [0, 32], sizes = [2, 32], strides = [1, 1]} : vector<2x128xf32> to vector<2x32xf32>
    %115 = vector.extract_strided_slice %112 {offsets = [0, 64], sizes = [2, 32], strides = [1, 1]} : vector<2x128xf32> to vector<2x32xf32>
    %116 = vector.extract_strided_slice %111 {offsets = [0, 96], sizes = [2, 32], strides = [1, 1]} : vector<2x128xf32> to vector<2x32xf32>
    %117 = arith.mulf %114, %100 : vector<2x32xf32>
    %118 = arith.mulf %113, %115 : vector<2x32xf32>
    %119 = arith.addf %117, %118 : vector<2x32xf32>
    %120 = math.tanh %119 : vector<2x32xf32>
    %121 = arith.mulf %116, %120 : vector<2x32xf32>
    %c10 = arith.constant 10 : index
    %c0_27 = arith.constant 0 : index
    %122 = vector.load %arg10[%c10, %c0_27] : memref<16x32xf32, #tpu.memory_space<vmem>>, vector<2x32xf32>
    tpu.vector_store %arg10[%c10, %c0_27], %121 {strides = array<i32>} : memref<16x32xf32, #tpu.memory_space<vmem>>, vector<2x32xf32>,
    %123 = vector.extract_strided_slice %5 {offsets = [12, 0], sizes = [2, 128], strides = [1, 1]} : vector<16x128xf32> to vector<2x128xf32>
    %cst_28 = arith.constant dense<0.000000e+00> : vector<2x128xf32>
    %124 = tpu.matmul %121, %6, %cst_28 {dimension_numbers = #tpu.dot_dimension_numbers<[1], [0], [0], [1], [0, 0, 1, 1], [], []>} : vector<2x32xf32>, vector<32x128xf32>, vector<2x128xf32> -> vector<2x128xf32>
    %125 = arith.addf %123, %124 : vector<2x128xf32>
    %126 = arith.negf %125 : vector<2x128xf32>
    %127 = math.exp %126 : vector<2x128xf32>
    %cst_29 = arith.constant 1.000000e+00 : f32
    %128 = vector.broadcast %cst_29 : f32 to vector<2x128xf32>
    %129 = arith.addf %128, %127 : vector<2x128xf32>
    %130 = arith.divf %128, %129 : vector<2x128xf32>
    %131 = math.tanh %125 : vector<2x128xf32>
    %132 = vector.extract_strided_slice %130 {offsets = [0, 0], sizes = [2, 32], strides = [1, 1]} : vector<2x128xf32> to vector<2x32xf32>
    %133 = vector.extract_strided_slice %130 {offsets = [0, 32], sizes = [2, 32], strides = [1, 1]} : vector<2x128xf32> to vector<2x32xf32>
    %134 = vector.extract_strided_slice %131 {offsets = [0, 64], sizes = [2, 32], strides = [1, 1]} : vector<2x128xf32> to vector<2x32xf32>
    %135 = vector.extract_strided_slice %130 {offsets = [0, 96], sizes = [2, 32], strides = [1, 1]} : vector<2x128xf32> to vector<2x32xf32>
    %136 = arith.mulf %133, %119 : vector<2x32xf32>
    %137 = arith.mulf %132, %134 : vector<2x32xf32>
    %138 = arith.addf %136, %137 : vector<2x32xf32>
    %139 = math.tanh %138 : vector<2x32xf32>
    %140 = arith.mulf %135, %139 : vector<2x32xf32>
    %c12 = arith.constant 12 : index
    %c0_30 = arith.constant 0 : index
    %141 = vector.load %arg10[%c12, %c0_30] : memref<16x32xf32, #tpu.memory_space<vmem>>, vector<2x32xf32>
    tpu.vector_store %arg10[%c12, %c0_30], %140 {strides = array<i32>} : memref<16x32xf32, #tpu.memory_space<vmem>>, vector<2x32xf32>,
    %142 = vector.extract_strided_slice %5 {offsets = [14, 0], sizes = [2, 128], strides = [1, 1]} : vector<16x128xf32> to vector<2x128xf32>
    %cst_31 = arith.constant dense<0.000000e+00> : vector<2x128xf32>
    %143 = tpu.matmul %140, %6, %cst_31 {dimension_numbers = #tpu.dot_dimension_numbers<[1], [0], [0], [1], [0, 0, 1, 1], [], []>} : vector<2x32xf32>, vector<32x128xf32>, vector<2x128xf32> -> vector<2x128xf32>
    %144 = arith.addf %142, %143 : vector<2x128xf32>
    %145 = arith.negf %144 : vector<2x128xf32>
    %146 = math.exp %145 : vector<2x128xf32>
    %cst_32 = arith.constant 1.000000e+00 : f32
    %147 = vector.broadcast %cst_32 : f32 to vector<2x128xf32>
    %148 = arith.addf %147, %146 : vector<2x128xf32>
    %149 = arith.divf %147, %148 : vector<2x128xf32>
    %150 = math.tanh %144 : vector<2x128xf32>
    %151 = vector.extract_strided_slice %149 {offsets = [0, 0], sizes = [2, 32], strides = [1, 1]} : vector<2x128xf32> to vector<2x32xf32>
    %152 = vector.extract_strided_slice %149 {offsets = [0, 32], sizes = [2, 32], strides = [1, 1]} : vector<2x128xf32> to vector<2x32xf32>
    %153 = vector.extract_strided_slice %150 {offsets = [0, 64], sizes = [2, 32], strides = [1, 1]} : vector<2x128xf32> to vector<2x32xf32>
    %154 = vector.extract_strided_slice %149 {offsets = [0, 96], sizes = [2, 32], strides = [1, 1]} : vector<2x128xf32> to vector<2x32xf32>
    %155 = arith.mulf %152, %138 : vector<2x32xf32>
    %156 = arith.mulf %151, %153 : vector<2x32xf32>
    %157 = arith.addf %155, %156 : vector<2x32xf32>
    %158 = math.tanh %157 : vector<2x32xf32>
    %159 = arith.mulf %154, %158 : vector<2x32xf32>
    %c14 = arith.constant 14 : index
    %c0_33 = arith.constant 0 : index
    %160 = vector.load %arg10[%c14, %c0_33] : memref<16x32xf32, #tpu.memory_space<vmem>>, vector<2x32xf32>
    tpu.vector_store %arg10[%c14, %c0_33], %159 {strides = array<i32>} : memref<16x32xf32, #tpu.memory_space<vmem>>, vector<2x32xf32>,
    %c0_34 = arith.constant 0 : index
    %c0_35 = arith.constant 0 : index
    %161 = vector.load %arg10[%c0_34, %c0_35] : memref<16x32xf32, #tpu.memory_space<vmem>>, vector<16x32xf32>
    %c0_36 = arith.constant 0 : index
    %c0_37 = arith.constant 0 : index
    %162 = vector.load %arg4[%c0_36, %c0_37] : memref<32x128xf32, #tpu.memory_space<vmem>>, vector<32x128xf32>
    %cst_38 = arith.constant dense<0.000000e+00> : vector<16x128xf32>
    %163 = tpu.matmul %161, %162, %cst_38 {dimension_numbers = #tpu.dot_dimension_numbers<[1], [0], [0], [1], [0, 0, 1, 1], [], []>} : vector<16x32xf32>, vector<32x128xf32>, vector<16x128xf32> -> vector<16x128xf32>
    %c0_39 = arith.constant 0 : index
    %c0_40 = arith.constant 0 : index
    %164 = vector.load %arg6[%c0_39, %c0_40] : memref<1x128xf32, #tpu.memory_space<vmem>>, vector<1x128xf32>
    %165 = vector.broadcast %164 : vector<1x128xf32> to vector<16x128xf32>
    %166 = arith.addf %163, %165 : vector<16x128xf32>
    %c0_41 = arith.constant 0 : index
    %c0_42 = arith.constant 0 : index
    %167 = vector.load %arg5[%c0_41, %c0_42] : memref<32x128xf32, #tpu.memory_space<vmem>>, vector<32x128xf32>
    %cst_43 = arith.constant 0.000000e+00 : f32
    %168 = vector.broadcast %cst_43 : f32 to vector<2x32xf32>
    %cst_44 = arith.constant 0.000000e+00 : f32
    %169 = vector.broadcast %cst_44 : f32 to vector<2x32xf32>
    %170 = vector.extract_strided_slice %166 {offsets = [0, 0], sizes = [2, 128], strides = [1, 1]} : vector<16x128xf32> to vector<2x128xf32>
    %cst_45 = arith.constant dense<0.000000e+00> : vector<2x128xf32>
    %171 = tpu.matmul %168, %167, %cst_45 {dimension_numbers = #tpu.dot_dimension_numbers<[1], [0], [0], [1], [0, 0, 1, 1], [], []>} : vector<2x32xf32>, vector<32x128xf32>, vector<2x128xf32> -> vector<2x128xf32>
    %172 = arith.addf %170, %171 : vector<2x128xf32>
    %173 = arith.negf %172 : vector<2x128xf32>
    %174 = math.exp %173 : vector<2x128xf32>
    %cst_46 = arith.constant 1.000000e+00 : f32
    %175 = vector.broadcast %cst_46 : f32 to vector<2x128xf32>
    %176 = arith.addf %175, %174 : vector<2x128xf32>
    %177 = arith.divf %175, %176 : vector<2x128xf32>
    %178 = math.tanh %172 : vector<2x128xf32>
    %179 = vector.extract_strided_slice %177 {offsets = [0, 0], sizes = [2, 32], strides = [1, 1]} : vector<2x128xf32> to vector<2x32xf32>
    %180 = vector.extract_strided_slice %177 {offsets = [0, 32], sizes = [2, 32], strides = [1, 1]} : vector<2x128xf32> to vector<2x32xf32>
    %181 = vector.extract_strided_slice %178 {offsets = [0, 64], sizes = [2, 32], strides = [1, 1]} : vector<2x128xf32> to vector<2x32xf32>
    %182 = vector.extract_strided_slice %177 {offsets = [0, 96], sizes = [2, 32], strides = [1, 1]} : vector<2x128xf32> to vector<2x32xf32>
    %183 = arith.mulf %180, %169 : vector<2x32xf32>
    %184 = arith.mulf %179, %181 : vector<2x32xf32>
    %185 = arith.addf %183, %184 : vector<2x32xf32>
    %186 = math.tanh %185 : vector<2x32xf32>
    %187 = arith.mulf %182, %186 : vector<2x32xf32>
    %c0_47 = arith.constant 0 : index
    %c0_48 = arith.constant 0 : index
    %188 = vector.load %arg10[%c0_47, %c0_48] : memref<16x32xf32, #tpu.memory_space<vmem>>, vector<2x32xf32>
    tpu.vector_store %arg10[%c0_47, %c0_48], %187 {strides = array<i32>} : memref<16x32xf32, #tpu.memory_space<vmem>>, vector<2x32xf32>,
    %189 = vector.extract_strided_slice %166 {offsets = [2, 0], sizes = [2, 128], strides = [1, 1]} : vector<16x128xf32> to vector<2x128xf32>
    %cst_49 = arith.constant dense<0.000000e+00> : vector<2x128xf32>
    %190 = tpu.matmul %187, %167, %cst_49 {dimension_numbers = #tpu.dot_dimension_numbers<[1], [0], [0], [1], [0, 0, 1, 1], [], []>} : vector<2x32xf32>, vector<32x128xf32>, vector<2x128xf32> -> vector<2x128xf32>
    %191 = arith.addf %189, %190 : vector<2x128xf32>
    %192 = arith.negf %191 : vector<2x128xf32>
    %193 = math.exp %192 : vector<2x128xf32>
    %cst_50 = arith.constant 1.000000e+00 : f32
    %194 = vector.broadcast %cst_50 : f32 to vector<2x128xf32>
    %195 = arith.addf %194, %193 : vector<2x128xf32>
    %196 = arith.divf %194, %195 : vector<2x128xf32>
    %197 = math.tanh %191 : vector<2x128xf32>
    %198 = vector.extract_strided_slice %196 {offsets = [0, 0], sizes = [2, 32], strides = [1, 1]} : vector<2x128xf32> to vector<2x32xf32>
    %199 = vector.extract_strided_slice %196 {offsets = [0, 32], sizes = [2, 32], strides = [1, 1]} : vector<2x128xf32> to vector<2x32xf32>
    %200 = vector.extract_strided_slice %197 {offsets = [0, 64], sizes = [2, 32], strides = [1, 1]} : vector<2x128xf32> to vector<2x32xf32>
    %201 = vector.extract_strided_slice %196 {offsets = [0, 96], sizes = [2, 32], strides = [1, 1]} : vector<2x128xf32> to vector<2x32xf32>
    %202 = arith.mulf %199, %185 : vector<2x32xf32>
    %203 = arith.mulf %198, %200 : vector<2x32xf32>
    %204 = arith.addf %202, %203 : vector<2x32xf32>
    %205 = math.tanh %204 : vector<2x32xf32>
    %206 = arith.mulf %201, %205 : vector<2x32xf32>
    %c2_51 = arith.constant 2 : index
    %c0_52 = arith.constant 0 : index
    %207 = vector.load %arg10[%c2_51, %c0_52] : memref<16x32xf32, #tpu.memory_space<vmem>>, vector<2x32xf32>
    tpu.vector_store %arg10[%c2_51, %c0_52], %206 {strides = array<i32>} : memref<16x32xf32, #tpu.memory_space<vmem>>, vector<2x32xf32>,
    %208 = vector.extract_strided_slice %166 {offsets = [4, 0], sizes = [2, 128], strides = [1, 1]} : vector<16x128xf32> to vector<2x128xf32>
    %cst_53 = arith.constant dense<0.000000e+00> : vector<2x128xf32>
    %209 = tpu.matmul %206, %167, %cst_53 {dimension_numbers = #tpu.dot_dimension_numbers<[1], [0], [0], [1], [0, 0, 1, 1], [], []>} : vector<2x32xf32>, vector<32x128xf32>, vector<2x128xf32> -> vector<2x128xf32>
    %210 = arith.addf %208, %209 : vector<2x128xf32>
    %211 = arith.negf %210 : vector<2x128xf32>
    %212 = math.exp %211 : vector<2x128xf32>
    %cst_54 = arith.constant 1.000000e+00 : f32
    %213 = vector.broadcast %cst_54 : f32 to vector<2x128xf32>
    %214 = arith.addf %213, %212 : vector<2x128xf32>
    %215 = arith.divf %213, %214 : vector<2x128xf32>
    %216 = math.tanh %210 : vector<2x128xf32>
    %217 = vector.extract_strided_slice %215 {offsets = [0, 0], sizes = [2, 32], strides = [1, 1]} : vector<2x128xf32> to vector<2x32xf32>
    %218 = vector.extract_strided_slice %215 {offsets = [0, 32], sizes = [2, 32], strides = [1, 1]} : vector<2x128xf32> to vector<2x32xf32>
    %219 = vector.extract_strided_slice %216 {offsets = [0, 64], sizes = [2, 32], strides = [1, 1]} : vector<2x128xf32> to vector<2x32xf32>
    %220 = vector.extract_strided_slice %215 {offsets = [0, 96], sizes = [2, 32], strides = [1, 1]} : vector<2x128xf32> to vector<2x32xf32>
    %221 = arith.mulf %218, %204 : vector<2x32xf32>
    %222 = arith.mulf %217, %219 : vector<2x32xf32>
    %223 = arith.addf %221, %222 : vector<2x32xf32>
    %224 = math.tanh %223 : vector<2x32xf32>
    %225 = arith.mulf %220, %224 : vector<2x32xf32>
    %c4_55 = arith.constant 4 : index
    %c0_56 = arith.constant 0 : index
    %226 = vector.load %arg10[%c4_55, %c0_56] : memref<16x32xf32, #tpu.memory_space<vmem>>, vector<2x32xf32>
    tpu.vector_store %arg10[%c4_55, %c0_56], %225 {strides = array<i32>} : memref<16x32xf32, #tpu.memory_space<vmem>>, vector<2x32xf32>,
    %227 = vector.extract_strided_slice %166 {offsets = [6, 0], sizes = [2, 128], strides = [1, 1]} : vector<16x128xf32> to vector<2x128xf32>
    %cst_57 = arith.constant dense<0.000000e+00> : vector<2x128xf32>
    %228 = tpu.matmul %225, %167, %cst_57 {dimension_numbers = #tpu.dot_dimension_numbers<[1], [0], [0], [1], [0, 0, 1, 1], [], []>} : vector<2x32xf32>, vector<32x128xf32>, vector<2x128xf32> -> vector<2x128xf32>
    %229 = arith.addf %227, %228 : vector<2x128xf32>
    %230 = arith.negf %229 : vector<2x128xf32>
    %231 = math.exp %230 : vector<2x128xf32>
    %cst_58 = arith.constant 1.000000e+00 : f32
    %232 = vector.broadcast %cst_58 : f32 to vector<2x128xf32>
    %233 = arith.addf %232, %231 : vector<2x128xf32>
    %234 = arith.divf %232, %233 : vector<2x128xf32>
    %235 = math.tanh %229 : vector<2x128xf32>
    %236 = vector.extract_strided_slice %234 {offsets = [0, 0], sizes = [2, 32], strides = [1, 1]} : vector<2x128xf32> to vector<2x32xf32>
    %237 = vector.extract_strided_slice %234 {offsets = [0, 32], sizes = [2, 32], strides = [1, 1]} : vector<2x128xf32> to vector<2x32xf32>
    %238 = vector.extract_strided_slice %235 {offsets = [0, 64], sizes = [2, 32], strides = [1, 1]} : vector<2x128xf32> to vector<2x32xf32>
    %239 = vector.extract_strided_slice %234 {offsets = [0, 96], sizes = [2, 32], strides = [1, 1]} : vector<2x128xf32> to vector<2x32xf32>
    %240 = arith.mulf %237, %223 : vector<2x32xf32>
    %241 = arith.mulf %236, %238 : vector<2x32xf32>
    %242 = arith.addf %240, %241 : vector<2x32xf32>
    %243 = math.tanh %242 : vector<2x32xf32>
    %244 = arith.mulf %239, %243 : vector<2x32xf32>
    %c6_59 = arith.constant 6 : index
    %c0_60 = arith.constant 0 : index
    %245 = vector.load %arg10[%c6_59, %c0_60] : memref<16x32xf32, #tpu.memory_space<vmem>>, vector<2x32xf32>
    tpu.vector_store %arg10[%c6_59, %c0_60], %244 {strides = array<i32>} : memref<16x32xf32, #tpu.memory_space<vmem>>, vector<2x32xf32>,
    %246 = vector.extract_strided_slice %166 {offsets = [8, 0], sizes = [2, 128], strides = [1, 1]} : vector<16x128xf32> to vector<2x128xf32>
    %cst_61 = arith.constant dense<0.000000e+00> : vector<2x128xf32>
    %247 = tpu.matmul %244, %167, %cst_61 {dimension_numbers = #tpu.dot_dimension_numbers<[1], [0], [0], [1], [0, 0, 1, 1], [], []>} : vector<2x32xf32>, vector<32x128xf32>, vector<2x128xf32> -> vector<2x128xf32>
    %248 = arith.addf %246, %247 : vector<2x128xf32>
    %249 = arith.negf %248 : vector<2x128xf32>
    %250 = math.exp %249 : vector<2x128xf32>
    %cst_62 = arith.constant 1.000000e+00 : f32
    %251 = vector.broadcast %cst_62 : f32 to vector<2x128xf32>
    %252 = arith.addf %251, %250 : vector<2x128xf32>
    %253 = arith.divf %251, %252 : vector<2x128xf32>
    %254 = math.tanh %248 : vector<2x128xf32>
    %255 = vector.extract_strided_slice %253 {offsets = [0, 0], sizes = [2, 32], strides = [1, 1]} : vector<2x128xf32> to vector<2x32xf32>
    %256 = vector.extract_strided_slice %253 {offsets = [0, 32], sizes = [2, 32], strides = [1, 1]} : vector<2x128xf32> to vector<2x32xf32>
    %257 = vector.extract_strided_slice %254 {offsets = [0, 64], sizes = [2, 32], strides = [1, 1]} : vector<2x128xf32> to vector<2x32xf32>
    %258 = vector.extract_strided_slice %253 {offsets = [0, 96], sizes = [2, 32], strides = [1, 1]} : vector<2x128xf32> to vector<2x32xf32>
    %259 = arith.mulf %256, %242 : vector<2x32xf32>
    %260 = arith.mulf %255, %257 : vector<2x32xf32>
    %261 = arith.addf %259, %260 : vector<2x32xf32>
    %262 = math.tanh %261 : vector<2x32xf32>
    %263 = arith.mulf %258, %262 : vector<2x32xf32>
    %c8_63 = arith.constant 8 : index
    %c0_64 = arith.constant 0 : index
    %264 = vector.load %arg10[%c8_63, %c0_64] : memref<16x32xf32, #tpu.memory_space<vmem>>, vector<2x32xf32>
    tpu.vector_store %arg10[%c8_63, %c0_64], %263 {strides = array<i32>} : memref<16x32xf32, #tpu.memory_space<vmem>>, vector<2x32xf32>,
    %265 = vector.extract_strided_slice %166 {offsets = [10, 0], sizes = [2, 128], strides = [1, 1]} : vector<16x128xf32> to vector<2x128xf32>
    %cst_65 = arith.constant dense<0.000000e+00> : vector<2x128xf32>
    %266 = tpu.matmul %263, %167, %cst_65 {dimension_numbers = #tpu.dot_dimension_numbers<[1], [0], [0], [1], [0, 0, 1, 1], [], []>} : vector<2x32xf32>, vector<32x128xf32>, vector<2x128xf32> -> vector<2x128xf32>
    %267 = arith.addf %265, %266 : vector<2x128xf32>
    %268 = arith.negf %267 : vector<2x128xf32>
    %269 = math.exp %268 : vector<2x128xf32>
    %cst_66 = arith.constant 1.000000e+00 : f32
    %270 = vector.broadcast %cst_66 : f32 to vector<2x128xf32>
    %271 = arith.addf %270, %269 : vector<2x128xf32>
    %272 = arith.divf %270, %271 : vector<2x128xf32>
    %273 = math.tanh %267 : vector<2x128xf32>
    %274 = vector.extract_strided_slice %272 {offsets = [0, 0], sizes = [2, 32], strides = [1, 1]} : vector<2x128xf32> to vector<2x32xf32>
    %275 = vector.extract_strided_slice %272 {offsets = [0, 32], sizes = [2, 32], strides = [1, 1]} : vector<2x128xf32> to vector<2x32xf32>
    %276 = vector.extract_strided_slice %273 {offsets = [0, 64], sizes = [2, 32], strides = [1, 1]} : vector<2x128xf32> to vector<2x32xf32>
    %277 = vector.extract_strided_slice %272 {offsets = [0, 96], sizes = [2, 32], strides = [1, 1]} : vector<2x128xf32> to vector<2x32xf32>
    %278 = arith.mulf %275, %261 : vector<2x32xf32>
    %279 = arith.mulf %274, %276 : vector<2x32xf32>
    %280 = arith.addf %278, %279 : vector<2x32xf32>
    %281 = math.tanh %280 : vector<2x32xf32>
    %282 = arith.mulf %277, %281 : vector<2x32xf32>
    %c10_67 = arith.constant 10 : index
    %c0_68 = arith.constant 0 : index
    %283 = vector.load %arg10[%c10_67, %c0_68] : memref<16x32xf32, #tpu.memory_space<vmem>>, vector<2x32xf32>
    tpu.vector_store %arg10[%c10_67, %c0_68], %282 {strides = array<i32>} : memref<16x32xf32, #tpu.memory_space<vmem>>, vector<2x32xf32>,
    %284 = vector.extract_strided_slice %166 {offsets = [12, 0], sizes = [2, 128], strides = [1, 1]} : vector<16x128xf32> to vector<2x128xf32>
    %cst_69 = arith.constant dense<0.000000e+00> : vector<2x128xf32>
    %285 = tpu.matmul %282, %167, %cst_69 {dimension_numbers = #tpu.dot_dimension_numbers<[1], [0], [0], [1], [0, 0, 1, 1], [], []>} : vector<2x32xf32>, vector<32x128xf32>, vector<2x128xf32> -> vector<2x128xf32>
    %286 = arith.addf %284, %285 : vector<2x128xf32>
    %287 = arith.negf %286 : vector<2x128xf32>
    %288 = math.exp %287 : vector<2x128xf32>
    %cst_70 = arith.constant 1.000000e+00 : f32
    %289 = vector.broadcast %cst_70 : f32 to vector<2x128xf32>
    %290 = arith.addf %289, %288 : vector<2x128xf32>
    %291 = arith.divf %289, %290 : vector<2x128xf32>
    %292 = math.tanh %286 : vector<2x128xf32>
    %293 = vector.extract_strided_slice %291 {offsets = [0, 0], sizes = [2, 32], strides = [1, 1]} : vector<2x128xf32> to vector<2x32xf32>
    %294 = vector.extract_strided_slice %291 {offsets = [0, 32], sizes = [2, 32], strides = [1, 1]} : vector<2x128xf32> to vector<2x32xf32>
    %295 = vector.extract_strided_slice %292 {offsets = [0, 64], sizes = [2, 32], strides = [1, 1]} : vector<2x128xf32> to vector<2x32xf32>
    %296 = vector.extract_strided_slice %291 {offsets = [0, 96], sizes = [2, 32], strides = [1, 1]} : vector<2x128xf32> to vector<2x32xf32>
    %297 = arith.mulf %294, %280 : vector<2x32xf32>
    %298 = arith.mulf %293, %295 : vector<2x32xf32>
    %299 = arith.addf %297, %298 : vector<2x32xf32>
    %300 = math.tanh %299 : vector<2x32xf32>
    %301 = arith.mulf %296, %300 : vector<2x32xf32>
    %c12_71 = arith.constant 12 : index
    %c0_72 = arith.constant 0 : index
    %302 = vector.load %arg10[%c12_71, %c0_72] : memref<16x32xf32, #tpu.memory_space<vmem>>, vector<2x32xf32>
    tpu.vector_store %arg10[%c12_71, %c0_72], %301 {strides = array<i32>} : memref<16x32xf32, #tpu.memory_space<vmem>>, vector<2x32xf32>,
    %303 = vector.extract_strided_slice %166 {offsets = [14, 0], sizes = [2, 128], strides = [1, 1]} : vector<16x128xf32> to vector<2x128xf32>
    %cst_73 = arith.constant dense<0.000000e+00> : vector<2x128xf32>
    %304 = tpu.matmul %301, %167, %cst_73 {dimension_numbers = #tpu.dot_dimension_numbers<[1], [0], [0], [1], [0, 0, 1, 1], [], []>} : vector<2x32xf32>, vector<32x128xf32>, vector<2x128xf32> -> vector<2x128xf32>
    %305 = arith.addf %303, %304 : vector<2x128xf32>
    %306 = arith.negf %305 : vector<2x128xf32>
    %307 = math.exp %306 : vector<2x128xf32>
    %cst_74 = arith.constant 1.000000e+00 : f32
    %308 = vector.broadcast %cst_74 : f32 to vector<2x128xf32>
    %309 = arith.addf %308, %307 : vector<2x128xf32>
    %310 = arith.divf %308, %309 : vector<2x128xf32>
    %311 = math.tanh %305 : vector<2x128xf32>
    %312 = vector.extract_strided_slice %310 {offsets = [0, 0], sizes = [2, 32], strides = [1, 1]} : vector<2x128xf32> to vector<2x32xf32>
    %313 = vector.extract_strided_slice %310 {offsets = [0, 32], sizes = [2, 32], strides = [1, 1]} : vector<2x128xf32> to vector<2x32xf32>
    %314 = vector.extract_strided_slice %311 {offsets = [0, 64], sizes = [2, 32], strides = [1, 1]} : vector<2x128xf32> to vector<2x32xf32>
    %315 = vector.extract_strided_slice %310 {offsets = [0, 96], sizes = [2, 32], strides = [1, 1]} : vector<2x128xf32> to vector<2x32xf32>
    %316 = arith.mulf %313, %299 : vector<2x32xf32>
    %317 = arith.mulf %312, %314 : vector<2x32xf32>
    %318 = arith.addf %316, %317 : vector<2x32xf32>
    %319 = math.tanh %318 : vector<2x32xf32>
    %320 = arith.mulf %315, %319 : vector<2x32xf32>
    %c14_75 = arith.constant 14 : index
    %c0_76 = arith.constant 0 : index
    %321 = vector.load %arg10[%c14_75, %c0_76] : memref<16x32xf32, #tpu.memory_space<vmem>>, vector<2x32xf32>
    tpu.vector_store %arg10[%c14_75, %c0_76], %320 {strides = array<i32>} : memref<16x32xf32, #tpu.memory_space<vmem>>, vector<2x32xf32>,
    %c0_77 = arith.constant 0 : index
    %c0_78 = arith.constant 0 : index
    %322 = vector.load %arg10[%c0_77, %c0_78] : memref<16x32xf32, #tpu.memory_space<vmem>>, vector<16x32xf32>
    %c0_79 = arith.constant 0 : index
    %c0_80 = arith.constant 0 : index
    %323 = vector.load %arg7[%c0_79, %c0_80] : memref<32x1xf32, #tpu.memory_space<vmem>>, vector<32x1xf32>
    %cst_81 = arith.constant dense<0.000000e+00> : vector<16x1xf32>
    %324 = tpu.matmul %322, %323, %cst_81 {dimension_numbers = #tpu.dot_dimension_numbers<[1], [0], [0], [1], [0, 0, 1, 1], [], []>} : vector<16x32xf32>, vector<32x1xf32>, vector<16x1xf32> -> vector<16x1xf32>
    %c0_82 = arith.constant 0 : index
    %c0_83 = arith.constant 0 : index
    %325 = vector.load %arg8[%c0_82, %c0_83] : memref<1x1xf32, #tpu.memory_space<vmem>>, vector<1x1xf32>
    %326 = vector.broadcast %325 : vector<1x1xf32> to vector<16x1xf32>
    %327 = arith.addf %324, %326 : vector<16x1xf32>
    %c0_84 = arith.constant 0 : index
    %c0_85 = arith.constant 0 : index
    %328 = vector.load %arg9[%c0_84, %c0_85] : memref<16x1xf32, #tpu.memory_space<vmem>>, vector<16x1xf32>
    tpu.vector_store %arg9[%c0_84, %c0_85], %327 {strides = array<i32>} : memref<16x1xf32, #tpu.memory_space<vmem>>, vector<16x1xf32>,
    return
  }
}

</mosaic_0001>

<bundles_post_ra>
// kernel: tpu_custom_call.1
= control target key start
LH: loop header
LB: loop body
LE: loop exit
PB: predicated region body
PF: predicated region fallthrough
CT: control target
= control target key end

     0   :  { %s3119_s0 = inlined_call_operand.vmem [shape: f32[16,4], index: 0, kind: input, shape index: {}]   ;;  %s3120_s1 = inlined_call_operand.hbm [shape: f32[4,128], index: 1, kind: input, shape index: {}]   ;;  %s3121_s2 = inlined_call_operand.vmem [shape: f32[32,128], index: 2, kind: input, shape index: {}]   ;;  %s3122_s3 = inlined_call_operand.hbm [shape: f32[1,128], index: 3, kind: input, shape index: {}]   ;;  %s3123_s4 = inlined_call_operand.hbm [shape: f32[32,128], index: 4, kind: input, shape index: {}]   ;;  %s3124_s5 = inlined_call_operand.vmem [shape: f32[32,128], index: 5, kind: input, shape index: {}]   ;;  %s3125_s6 = inlined_call_operand.vmem [shape: f32[1,128], index: 6, kind: input, shape index: {}]   ;;  %s3126_s7 = inlined_call_operand.vmem [shape: f32[32,1], index: 7, kind: input, shape index: {}]   ;;  %s3127_s8 = inlined_call_operand.<no memory space> [shape: f32[1,1], index: 8, kind: input, shape index: {}]   ;;  %s3128_s9 = inlined_call_operand.vmem [shape: f32[16,1], index: 9, kind: output, shape index: {}]  }
   0x1   :  { %v14_v0 = vstv %s3127_s8 }
   0x2   :  { %15 = vst [vmem:[#allocation3] sm:$0x1] %v14_v0 }
   0x3   :  { %16 = vsyncpa [#allocation5], 0 }
   0x4   :  { %17 = vsyncpa [#allocation7], 0  ;;  %s2655_s11 = smov [#allocation6]   ;;  %s2656_s13 = smov [#allocation4]  }
   0x5   :  { %s38_s12 = sshll.u32 %s2655_s11, 4  ;;  %s26_s14 = sshll.u32 %s2656_s13, 4  ;;  %s39_s12 = int_to_ptr.vmem [resolvable:$true] %s38_s12  ;;  %s27_s14 = int_to_ptr.vmem [resolvable:$true] %s26_s14 }
   0x6   :  { %s2599_s15 = scalar_lea.vmem %s39_s12, 16  ;;  %s2603_s16 = scalar_lea.vmem %s39_s12, 32 }
   0x7   :  { %p2600_p0 = scmp.ne.s32.totalorder %s39_s12, %s2599_s15  ;;  %p2604_p1 = scmp.lt.s32.totalorder %s39_s12, %s39_s12 }
   0x8   :  { %p2605_p2 = scmp.lt.s32.totalorder %s2603_s16, %s2599_s15 }
   0xa   :  { %p2606_p3 = por %p2605_p2, %p2604_p1 }
   0xc   :  { %p2607_p4 = pnand %p2606_p3, %p2600_p0 }
   0xe   :  { %2610 = shalt.err (!%p2607_p4)
}
   0xf   :  { %41 = dma.hbm_to_vmem [thread:$0]  %s3122_s3, 16, %s39_s12, [#allocation7]  }
  0x10   :  { %s2619_s8 = scalar_lea.vmem %s27_s14, 64  ;;  %p2624_p6 = scmp.lt.s32.totalorder %s27_s14, %s27_s14 }
  0x11   :  { %p2620_p5 = scmp.ne.s32.totalorder %s27_s14, %s2619_s8  ;;  %p2625_p7 = scmp.lt.s32.totalorder %s2619_s8, %s2619_s8 }
  0x13   :  { %p2626_p8 = por %p2625_p7, %p2624_p6 }
  0x15   :  { %p2627_p9 = pnand %p2626_p8, %p2620_p5 }
  0x17   :  { %2630 = shalt.err (!%p2627_p9)
}
  0x18   :  { %29 = dma.hbm_to_vmem [thread:$0]  %s3120_s1, 64, %s27_s14, [#allocation5]  }
  0x19   :  { %s2657_s21 = smov [#allocation8]  }
  0x1a   :  { %s47_s22 = sshll.u32 %s2657_s21, 4  ;;  %s48_s22 = int_to_ptr.vmem [resolvable:$true] %s47_s22 }
  0x1b   :  { %s2639_s23 = scalar_lea.vmem %s48_s22, 512  ;;  %p2644_p11 = scmp.lt.s32.totalorder %s48_s22, %s48_s22 }
  0x1c   :  { %p2640_p10 = scmp.ne.s32.totalorder %s48_s22, %s2639_s23  ;;  %p2645_p12 = scmp.lt.s32.totalorder %s2639_s23, %s2639_s23 }
  0x1e   :  { %p2646_p13 = por %p2645_p12, %p2644_p11 }
  0x20   :  { %p2647_p0 = pnand %p2646_p13, %p2640_p10 }
  0x22   :  { %2650 = shalt.err (!%p2647_p0)
}
  0x23   :  { %s2658_s3 = smov 128   ;;  %s2659_s24 = smov 8  }
  0x24   :  { %53 = dma.hbm_to_vmem [thread:$0]  %s3123_s4, 512, %s48_s22, [#allocation7], %s2658_s3, %s2658_s3, %s2659_s24  }
  0x25   :  { %2651 = dma.done.wait [#allocation5], 64  }
  0x26   :  { %2652 = vsyncadd [#allocation5], 4294967232 }
  0x27   :  { %2653 = dma.done.wait [#allocation7], 528  }
  0x28   :  { %2654 = vsyncadd [#allocation7], 4294966768  ;;  %v2660_v1 = vmov 0.0   ;;  %vm2661_vm0 = vmmov 0   ;;  %vm88_vm1 = vcmask 1043456   ;;  %vm81_vm2 = vcmask 31744  }
  0x29   :  { %2256 = vmatprep.subr.mxu1 %v2660_v1  ;;  %2264 = vmatprep.mubr.msk.f32.mxu1 %vm2661_vm0, %v2660_v1  ;;  %v73_v2 = vld [vmem:[#allocation4] sm:$0xf]  ;;  %v2732_v3 = vld [vmem:[%s3121_s2 + $0x18] sm:$0xff]  ;;  %v71_v4 = vld [vmem:[%s3119_s0] sm:$0xff]  ;;  %s2663_s15 = smov 32   ;;  %vm274_vm3 = vcmask 254976  }
  0x2a   :  { %2251 = vmatprep.subr.msk.mxu0 %vm88_vm1, %v73_v2  ;;  %2257 = vmatpush3.msra.mxu1 %v2732_v3  ;;  %v72_v5 = vld [vmem:[%s3119_s0 + $0x8] sm:$0xff]  ;;  %v2744_v6 = vld [vmem:[%s3121_s2 + $0x10] sm:$0xff]  ;;  %v2758_v8 = vld [vmem:[%s3121_s2] sm:$0xff]  ;;  %vm171_vm4 = vcmask 261120   ;;  %vm383_vm5 = vcmask 257026   ;;  %vm607_vm6 = vcmask 261126  }
  0x2b   :  { %2252 = vmatpush3.msk.msra.mxu0 %vm88_vm1, %v73_v2  ;;  %2253 = vmatprep.mubr.msk.f32.mxu0 %vm81_vm2, %v71_v4  ;;  %v2750_v7 = vld [vmem:[%s3121_s2 + $0x8] sm:$0xff]  ;;  %v2116_v9 = vld [vmem:[#allocation6] ss:$0 sm:$0xff]  ;;  %s2662_s2 = smov 64   ;;  %vm495_vm7 = vcmask 259076   ;;  %vm2107_vm8 = vcmask 7168  }
  0x2c   :  { %2258 = vmatprep.subr.mxu1 %v2660_v1  ;;  %2254 = vmatmul.mubr.msk.f32.vlgmr.msra.gmra.mxu0 %vm81_vm2, %v72_v5 }
  0x2d   :  { %2259 = vmatpush3.msra.mxu1 %v2744_v6  ;;  %2267 = vmatprep.subr.mxu0 %v2660_v1 }
  0x2e   :  { %2260 = vmatprep.subr.mxu1 %v2660_v1  ;;  %2268 = vmatpush3.msra.mxu0 %v2732_v3 }
  0x2f   :  { %2261 = vmatpush3.msra.mxu1 %v2750_v7  ;;  %2269 = vmatprep.subr.mxu0 %v2660_v1 }
  0x30   :  { %2262 = vmatprep.subr.mxu1 %v2660_v1  ;;  %2270 = vmatpush3.msra.mxu0 %v2744_v6 }
  0x31   :  { %2263 = vmatpush3.msra.mxu1 %v2758_v8  ;;  %2271 = vmatprep.subr.mxu0 %v2660_v1 }
  0x32   :  { %2265 = vmatmul.mubr.f32.vlgmr.msra.gmra.mxu1 %v2660_v1  ;;  %2272 = vmatpush3.msra.mxu0 %v2750_v7 }
  0x33   :  { %2273 = vmatprep.subr.mxu0 %v2660_v1  ;;  %2275 = vmatprep.mubr.msk.f32.mxu0 %vm2661_vm0, %v2660_v1 }
  0x34   :  { %2274 = vmatpush3.msra.mxu0 %v2758_v8  ;;  %2278 = vmatprep.subr.mxu1 %v2660_v1 }
  0x35   :  { %2279 = vmatpush3.msra.mxu1 %v2732_v3  ;;  %2286 = vmatprep.mubr.msk.f32.mxu1 %vm2661_vm0, %v2660_v1 }
  0x36   :  { %2280 = vmatprep.subr.mxu1 %v2660_v1  ;;  %2289 = vmatprep.subr.mxu0 %v2660_v1 }
  0x37   :  { %2281 = vmatpush3.msra.mxu1 %v2744_v6 }
  0x38   :  { %2282 = vmatprep.subr.mxu1 %v2660_v1 }
  0x39   :  { %2283 = vmatpush3.msra.mxu1 %v2750_v7 }
  0x3a   :  { %2284 = vmatprep.subr.mxu1 %v2660_v1 }
  0x3b   :  { %2285 = vmatpush3.msra.mxu1 %v2758_v8 }
  0x3c   :  { %2300 = vmatprep.subr.mxu1 %v2660_v1 }
  0xec   :  { %v2255_v10 = vpop.f32.mrf.mxu0 }
  0xed   :  { %v2785_v11 = vadd.f32 %v2255_v10, %v2116_v9 }
  0xee   :  { %v158_v12 = vpop.f32.mrf.mxu0 }
  0xef   :  { %v2787_v13 = vadd.f32 %v2116_v9, %v158_v12 }
  0xf2   :  { %v241_v14 = vpop.f32.mrf.mxu1 }
  0xf3   :  { %v245_v15 = vadd.f32 %v241_v14, %v2787_v13 }
  0xf4   :  { %v2266_v16 = vpop.f32.mrf.mxu1 }
  0xf5   :  { %2463 = vtanh.f32 %v245_v15  ;;  %v2120_v18 = vmul.f32 -1.442695, %v245_v15 }
  0xf7   :  { %2465 = vpow2.f32 %v2120_v18 }
 0x102   :  { %v2464_v17 = vpop.eup %2463 }
 0x103   :  { %255 = vrot.lane.b32.xlu0 %v2464_v17, %s2662_s2 }
 0x104   :  { %v2466_v19 = vpop.eup %2465 }
 0x105   :  { %v249_v20 = vadd.f32 1.0, %v2466_v19 }
 0x107   :  { %2467 = vrcp.f32 %v249_v20 }
 0x114   :  { %v2468_v21 = vpop.eup %2467 }
 0x115   :  { %v253_v24 = vmul.f32 0.0, %v2468_v21 }
 0x175   :  { %v256_v22 = vpop.permute.xlu0 %255 }
 0x176   :  { %v258_v23 = vmul.f32 %v2468_v21, %v256_v22 }
 0x178   :  { %260 = vrot.lane.b32.xlu0 %v258_v23, %s2663_s15 }
 0x1ea   :  { %v261_v25 = vpop.permute.xlu0 %260 }
 0x1eb   :  { %v263_v26 = vadd.f32 %v261_v25, %v253_v24 }
 0x1ed   :  { %2469 = vtanh.f32 %v263_v26  ;;  %v360_v42 = vrot.slane %v263_v26, 6 }
 0x1fa   :  { %v2470_v27 = vpop.eup %2469 }
 0x1fb   :  { %266 = vrot.lane.b32.xlu1 %v2470_v27, %s2662_s2 }
 0x26d   :  { %v267_v28 = vpop.permute.xlu1 %266 }
 0x26e   :  { %v269_v29 = vmul.f32 %v2468_v21, %v267_v28 }
 0x270   :  { %271 = vrot.lane.b32.xlu1 %v269_v29, %s2663_s15 }
 0x2e2   :  { %v272_v30 = vpop.permute.xlu1 %271 }
 0x2e3   :  { %275 = vst.msk [vmem:[#allocation2] sm:$0x3] %vm274_vm3, %v272_v30  ;;  %2276 = vmatmul.mubr.msk.f32.vlgmr.msra.gmra.mxu0 %vm171_vm4, %v272_v30 }
 0x2e4   :  { %2290 = vmatpush3.msra.mxu0 %v2732_v3  ;;  %2297 = vmatprep.mubr.msk.f32.mxu0 %vm2661_vm0, %v2660_v1 }
 0x2e5   :  { %2291 = vmatprep.subr.mxu0 %v2660_v1 }
 0x2e6   :  { %2292 = vmatpush3.msra.mxu0 %v2744_v6 }
 0x2e7   :  { %2293 = vmatprep.subr.mxu0 %v2660_v1 }
 0x2e8   :  { %2294 = vmatpush3.msra.mxu0 %v2750_v7 }
 0x2e9   :  { %2295 = vmatprep.subr.mxu0 %v2660_v1 }
 0x2ea   :  { %2296 = vmatpush3.msra.mxu0 %v2758_v8 }
 0x2eb   :  { %2311 = vmatprep.subr.mxu0 %v2660_v1 }
 0x3a3   :  { %v344_v31 = vpop.f32.mrf.mxu0 }
 0x3a4   :  { %v349_v32 = vrot.slane %v344_v31, 6 }
 0x3a5   :  { %v2277_v33 = vpop.f32.mrf.mxu0 }
 0x3a6   :  { %v351_v34 = vadd.f32 %v349_v32, %v2787_v13 }
 0x3a8   :  { %2471 = vtanh.f32 %v351_v34  ;;  %v2122_v36 = vmul.f32 -1.442695, %v351_v34 }
 0x3aa   :  { %2473 = vpow2.f32 %v2122_v36 }
 0x3b5   :  { %v2472_v35 = vpop.eup %2471 }
 0x3b6   :  { %364 = vrot.lane.b32.xlu0 %v2472_v35, %s2662_s2 }
 0x3b7   :  { %v2474_v37 = vpop.eup %2473 }
 0x3b8   :  { %v355_v38 = vadd.f32 1.0, %v2474_v37 }
 0x3ba   :  { %2475 = vrcp.f32 %v355_v38 }
 0x3c7   :  { %v2476_v39 = vpop.eup %2475 }
 0x3c8   :  { %v362_v43 = vmul.f32 %v2476_v39, %v360_v42 }
 0x428   :  { %v365_v40 = vpop.permute.xlu0 %364 }
 0x429   :  { %v367_v41 = vmul.f32 %v2476_v39, %v365_v40 }
 0x42b   :  { %369 = vrot.lane.b32.xlu1 %v367_v41, %s2663_s15 }
 0x49d   :  { %v370_v44 = vpop.permute.xlu1 %369 }
 0x49e   :  { %v372_v45 = vadd.f32 %v370_v44, %v362_v43 }
 0x4a0   :  { %2477 = vtanh.f32 %v372_v45  ;;  %v472_v62 = vrot.slane %v372_v45, 6 }
 0x4ad   :  { %v2478_v46 = vpop.eup %2477 }
 0x4ae   :  { %375 = vrot.lane.b32.xlu0 %v2478_v46, %s2662_s2 }
 0x520   :  { %v376_v47 = vpop.permute.xlu0 %375 }
 0x521   :  { %v2810_v48 = vmul.f32 %v2476_v39, %v376_v47 }
 0x523   :  { %v385_v49 = vrot.slane %v2810_v48, 2 }
 0x525   :  { %386 = vrot.lane.b32.xlu1 %v385_v49, %s2663_s15 }
 0x597   :  { %v387_v50 = vpop.permute.xlu1 %386 }
 0x598   :  { %2287 = vmatmul.mubr.msk.f32.vlgmr.msra.gmra.mxu1 %vm171_vm4, %v387_v50 }
 0x599   :  { %2301 = vmatpush3.msra.mxu1 %v2732_v3  ;;  %2308 = vmatprep.mubr.msk.f32.mxu1 %vm2661_vm0, %v2660_v1 }
 0x59a   :  { %2302 = vmatprep.subr.mxu1 %v2660_v1 }
 0x59b   :  { %2303 = vmatpush3.msra.mxu1 %v2744_v6 }
 0x59c   :  { %2304 = vmatprep.subr.mxu1 %v2660_v1 }
 0x59d   :  { %2305 = vmatpush3.msra.mxu1 %v2750_v7 }
 0x59e   :  { %2306 = vmatprep.subr.mxu1 %v2660_v1 }
 0x59f   :  { %2307 = vmatpush3.msra.mxu1 %v2758_v8 }
 0x5a0   :  { %2322 = vmatprep.subr.mxu1 %v2660_v1 }
 0x658   :  { %v456_v51 = vpop.f32.mrf.mxu1 }
 0x659   :  { %v461_v52 = vrot.slane %v456_v51, 4 }
 0x65a   :  { %v2288_v53 = vpop.f32.mrf.mxu1 }
 0x65b   :  { %v463_v54 = vadd.f32 %v461_v52, %v2787_v13 }
 0x65d   :  { %2479 = vtanh.f32 %v463_v54  ;;  %v2124_v56 = vmul.f32 -1.442695, %v463_v54 }
 0x65f   :  { %2481 = vpow2.f32 %v2124_v56 }
 0x66a   :  { %v2480_v55 = vpop.eup %2479 }
 0x66b   :  { %476 = vrot.lane.b32.xlu0 %v2480_v55, %s2662_s2 }
 0x66c   :  { %v2482_v57 = vpop.eup %2481 }
 0x66d   :  { %v467_v58 = vadd.f32 1.0, %v2482_v57 }
 0x66f   :  { %2483 = vrcp.f32 %v467_v58 }
 0x67c   :  { %v2484_v59 = vpop.eup %2483 }
 0x67d   :  { %v474_v63 = vmul.f32 %v2484_v59, %v472_v62 }
 0x6dd   :  { %v477_v60 = vpop.permute.xlu0 %476 }
 0x6de   :  { %v479_v61 = vmul.f32 %v2484_v59, %v477_v60 }
 0x6e0   :  { %481 = vrot.lane.b32.xlu1 %v479_v61, %s2663_s15 }
 0x752   :  { %v482_v0 = vpop.permute.xlu1 %481 }
 0x753   :  { %v484_v2 = vadd.f32 %v482_v0, %v474_v63 }
 0x755   :  { %2485 = vtanh.f32 %v484_v2  ;;  %v584_v25 = vrot.slane %v484_v2, 6 }
 0x762   :  { %v2486_v4 = vpop.eup %2485 }
 0x763   :  { %487 = vrot.lane.b32.xlu0 %v2486_v4, %s2662_s2 }
 0x7d5   :  { %v488_v5 = vpop.permute.xlu0 %487 }
 0x7d6   :  { %v2829_v9 = vmul.f32 %v2484_v59, %v488_v5 }
 0x7d8   :  { %v497_v10 = vrot.slane %v2829_v9, 4 }
 0x7da   :  { %498 = vrot.lane.b32.xlu1 %v497_v10, %s2663_s15 }
 0x84c   :  { %v499_v12 = vpop.permute.xlu1 %498 }
 0x84d   :  { %2298 = vmatmul.mubr.msk.f32.vlgmr.msra.gmra.mxu0 %vm171_vm4, %v499_v12 }
 0x84e   :  { %2312 = vmatpush3.msra.mxu0 %v2732_v3  ;;  %2319 = vmatprep.mubr.msk.f32.mxu0 %vm2661_vm0, %v2660_v1 }
 0x84f   :  { %2313 = vmatprep.subr.mxu0 %v2660_v1 }
 0x850   :  { %2314 = vmatpush3.msra.mxu0 %v2744_v6 }
 0x851   :  { %2315 = vmatprep.subr.mxu0 %v2660_v1 }
 0x852   :  { %2316 = vmatpush3.msra.mxu0 %v2750_v7 }
 0x853   :  { %2317 = vmatprep.subr.mxu0 %v2660_v1 }
 0x854   :  { %2318 = vmatpush3.msra.mxu0 %v2758_v8 }
 0x855   :  { %2333 = vmatprep.subr.mxu0 %v2660_v1 }
 0x90d   :  { %v568_v14 = vpop.f32.mrf.mxu0 }
 0x90e   :  { %v573_v15 = vrot.slane %v568_v14, 2 }
 0x90f   :  { %v2299_v16 = vpop.f32.mrf.mxu0 }
 0x910   :  { %v575_v17 = vadd.f32 %v573_v15, %v2787_v13 }
 0x912   :  { %2487 = vtanh.f32 %v575_v17  ;;  %v2126_v19 = vmul.f32 -1.442695, %v575_v17 }
 0x914   :  { %2489 = vpow2.f32 %v2126_v19 }
 0x91f   :  { %v2488_v18 = vpop.eup %2487 }
 0x920   :  { %588 = vrot.lane.b32.xlu0 %v2488_v18, %s2662_s2 }
 0x921   :  { %v2490_v20 = vpop.eup %2489 }
 0x922   :  { %v579_v21 = vadd.f32 1.0, %v2490_v20 }
 0x924   :  { %2491 = vrcp.f32 %v579_v21 }
 0x931   :  { %v2492_v22 = vpop.eup %2491 }
 0x932   :  { %v586_v26 = vmul.f32 %v2492_v22, %v584_v25 }
 0x992   :  { %v589_v23 = vpop.permute.xlu0 %588 }
 0x993   :  { %v591_v24 = vmul.f32 %v2492_v22, %v589_v23 }
 0x995   :  { %593 = vrot.lane.b32.xlu1 %v591_v24, %s2663_s15 }
 0xa07   :  { %v594_v27 = vpop.permute.xlu1 %593 }
 0xa08   :  { %v596_v28 = vadd.f32 %v594_v27, %v586_v26 }
 0xa0a   :  { %2493 = vtanh.f32 %v596_v28  ;;  %v693_v43 = vrot.slane %v596_v28, 6 }
 0xa17   :  { %v2494_v13 = vpop.eup %2493 }
 0xa18   :  { %599 = vrot.lane.b32.xlu0 %v2494_v13, %s2662_s2 }
 0xa8a   :  { %v600_v29 = vpop.permute.xlu0 %599 }
 0xa8b   :  { %v2848_v30 = vmul.f32 %v2492_v22, %v600_v29 }
 0xa8d   :  { %v609_v31 = vrot.slane %v2848_v30, 6 }
 0xa8f   :  { %610 = vrot.lane.b32.xlu1 %v609_v31, %s2663_s15 }
 0xb01   :  { %v611_v32 = vpop.permute.xlu1 %610 }
 0xb02   :  { %2309 = vmatmul.mubr.msk.f32.vlgmr.msra.gmra.mxu1 %vm171_vm4, %v611_v32 }
 0xb03   :  { %2323 = vmatpush3.msra.mxu1 %v2732_v3  ;;  %2330 = vmatprep.mubr.msk.f32.mxu1 %vm2661_vm0, %v2660_v1 }
 0xb04   :  { %2324 = vmatprep.subr.mxu1 %v2660_v1 }
 0xb05   :  { %2325 = vmatpush3.msra.mxu1 %v2744_v6 }
 0xb06   :  { %2326 = vmatprep.subr.mxu1 %v2660_v1 }
 0xb07   :  { %2327 = vmatpush3.msra.mxu1 %v2750_v7 }
 0xb08   :  { %2328 = vmatprep.subr.mxu1 %v2660_v1 }
 0xb09   :  { %2329 = vmatpush3.msra.mxu1 %v2758_v8 }
 0xbc2   :  { %v680_v33 = vpop.f32.mrf.mxu1 }
 0xbc3   :  { %v684_v34 = vadd.f32 %v680_v33, %v2785_v11 }
 0xbc4   :  { %v2310_v35 = vpop.f32.mrf.mxu1 }
 0xbc5   :  { %2495 = vtanh.f32 %v684_v34  ;;  %v2128_v37 = vmul.f32 -1.442695, %v684_v34 }
 0xbc7   :  { %2497 = vpow2.f32 %v2128_v37 }
 0xbd2   :  { %v2496_v36 = vpop.eup %2495 }
 0xbd3   :  { %697 = vrot.lane.b32.xlu0 %v2496_v36, %s2662_s2 }
 0xbd4   :  { %v2498_v38 = vpop.eup %2497 }
 0xbd5   :  { %v688_v39 = vadd.f32 1.0, %v2498_v38 }
 0xbd7   :  { %2499 = vrcp.f32 %v688_v39 }
 0xbe4   :  { %v2500_v40 = vpop.eup %2499 }
 0xbe5   :  { %v695_v44 = vmul.f32 %v2500_v40, %v693_v43 }
 0xc45   :  { %v698_v41 = vpop.permute.xlu0 %697 }
 0xc46   :  { %v700_v42 = vmul.f32 %v2500_v40, %v698_v41 }
 0xc48   :  { %702 = vrot.lane.b32.xlu1 %v700_v42, %s2663_s15 }
 0xcba   :  { %v703_v45 = vpop.permute.xlu1 %702 }
 0xcbb   :  { %v705_v46 = vadd.f32 %v703_v45, %v695_v44 }
 0xcbd   :  { %2501 = vtanh.f32 %v705_v46 }
 0xcca   :  { %v2502_v47 = vpop.eup %2501 }
 0xccb   :  { %708 = vrot.lane.b32.xlu0 %v2502_v47, %s2662_s2 }
 0xd3d   :  { %v709_v49 = vpop.permute.xlu0 %708 }
 0xd3e   :  { %v711_v50 = vmul.f32 %v2500_v40, %v709_v49  ;;  %v1052_v49 = vld [vmem:[#allocation8 + $0x18] sm:$0xff] }
 0xd3f   :  { %2344 = vmatprep.subr.mxu1 %v1052_v49 }
 0xd40   :  { %713 = vrot.lane.b32.xlu1 %v711_v50, %s2663_s15  ;;  %v1051_v50 = vld [vmem:[#allocation8 + $0x10] sm:$0xff] }
 0xdb2   :  { %v714_v51 = vpop.permute.xlu1 %713 }
 0xdb3   :  { %716 = vst.msk [vmem:[#allocation2 + $0x8] sm:$0x3] %vm274_vm3, %v714_v51  ;;  %2320 = vmatmul.mubr.msk.f32.vlgmr.msra.gmra.mxu0 %vm171_vm4, %v714_v51  ;;  %v2915_v51 = vld [vmem:[%s3124_s5 + $0x18] sm:$0xff] }
 0xdb4   :  { %2334 = vmatpush3.msra.mxu0 %v2732_v3  ;;  %2341 = vmatprep.mubr.msk.f32.mxu0 %vm2661_vm0, %v2660_v1 }
 0xdb5   :  { %2335 = vmatprep.subr.mxu0 %v2660_v1 }
 0xdb6   :  { %2336 = vmatpush3.msra.mxu0 %v2744_v6 }
 0xdb7   :  { %2337 = vmatprep.subr.mxu0 %v2660_v1 }
 0xdb8   :  { %2338 = vmatpush3.msra.mxu0 %v2750_v7 }
 0xdb9   :  { %2339 = vmatprep.subr.mxu0 %v2660_v1 }
 0xdba   :  { %2340 = vmatpush3.msra.mxu0 %v2758_v8  ;;  %v801_v8 = vrot.slane %v705_v46, 6 }
 0xdbb   :  { %2355 = vmatprep.subr.mxu0 %v2660_v1 }
 0xe73   :  { %v785_v52 = vpop.f32.mrf.mxu0 }
 0xe74   :  { %v790_v53 = vrot.slane %v785_v52, 6  ;;  %v1050_v52 = vld [vmem:[#allocation8 + $0x8] sm:$0xff] }
 0xe75   :  { %v2321_v3 = vpop.f32.mrf.mxu0 }
 0xe76   :  { %v792_v54 = vadd.f32 %v790_v53, %v2785_v11  ;;  %v2921_v53 = vld [vmem:[%s3124_s5 + $0x10] sm:$0xff] }
 0xe77   :  { %v1049_v3 = vld [vmem:[#allocation8] sm:$0xff] }
 0xe78   :  { %2503 = vtanh.f32 %v792_v54  ;;  %v2130_v6 = vmul.f32 -1.442695, %v792_v54  ;;  %v2936_v54 = vld [vmem:[%s3124_s5] sm:$0xff] }
 0xe7a   :  { %2505 = vpow2.f32 %v2130_v6 }
 0xe85   :  { %v2504_v55 = vpop.eup %2503 }
 0xe86   :  { %805 = vrot.lane.b32.xlu0 %v2504_v55, %s2662_s2 }
 0xe87   :  { %v2506_v56 = vpop.eup %2505 }
 0xe88   :  { %v796_v57 = vadd.f32 1.0, %v2506_v56 }
 0xe8a   :  { %2507 = vrcp.f32 %v796_v57 }
 0xe97   :  { %v2508_v7 = vpop.eup %2507 }
 0xe98   :  { %v803_v60 = vmul.f32 %v2508_v7, %v801_v8 }
 0xef8   :  { %v806_v58 = vpop.permute.xlu0 %805 }
 0xef9   :  { %v808_v59 = vmul.f32 %v2508_v7, %v806_v58 }
 0xefb   :  { %810 = vrot.lane.b32.xlu1 %v808_v59, %s2663_s15 }
 0xf6d   :  { %v811_v61 = vpop.permute.xlu1 %810 }
 0xf6e   :  { %v813_v62 = vadd.f32 %v811_v61, %v803_v60  ;;  %v2135_v61 = vld [vmem:[%s3125_s6] ss:$0 sm:$0xff] }
 0xf70   :  { %2509 = vtanh.f32 %v813_v62  ;;  %v912_v23 = vrot.slane %v813_v62, 6 }
 0xf7d   :  { %v2510_v63 = vpop.eup %2509 }
 0xf7e   :  { %816 = vrot.lane.b32.xlu0 %v2510_v63, %s2662_s2 }
 0xff0   :  { %v817_v0 = vpop.permute.xlu0 %816 }
 0xff1   :  { %v2883_v2 = vmul.f32 %v2508_v7, %v817_v0 }
 0xff3   :  { %v825_v4 = vrot.slane %v2883_v2, 2 }
 0xff5   :  { %826 = vrot.lane.b32.xlu1 %v825_v4, %s2663_s15 }
0x1067   :  { %v827_v5 = vpop.permute.xlu1 %826 }
0x1068   :  { %2331 = vmatmul.mubr.msk.f32.vlgmr.msra.gmra.mxu1 %vm171_vm4, %v827_v5 }
0x1069   :  { %2345 = vmatpush3.msra.mxu1 %v1052_v49 }
0x106a   :  { %2346 = vmatprep.subr.mxu1 %v1051_v50 }
0x106b   :  { %2347 = vmatpush3.msra.mxu1 %v1051_v50 }
0x106c   :  { %2348 = vmatprep.subr.mxu1 %v1050_v52 }
0x106d   :  { %2349 = vmatpush3.msra.mxu1 %v1050_v52 }
0x106e   :  { %2350 = vmatprep.subr.mxu1 %v1049_v3 }
0x106f   :  { %2351 = vmatpush3.msra.mxu1 %v1049_v3 }
0x1070   :  { %2366 = vmatprep.subr.mxu1 %v2660_v1 }
0x1128   :  { %v896_v10 = vpop.f32.mrf.mxu1 }
0x1129   :  { %v901_v12 = vrot.slane %v896_v10, 4 }
0x112a   :  { %v2332_v14 = vpop.f32.mrf.mxu1 }
0x112b   :  { %v903_v15 = vadd.f32 %v901_v12, %v2785_v11 }
0x112d   :  { %2511 = vtanh.f32 %v903_v15  ;;  %v2132_v17 = vmul.f32 -1.442695, %v903_v15 }
0x112f   :  { %2513 = vpow2.f32 %v2132_v17 }
0x113a   :  { %v2512_v16 = vpop.eup %2511 }
0x113b   :  { %916 = vrot.lane.b32.xlu0 %v2512_v16, %s2662_s2 }
0x113c   :  { %v2514_v18 = vpop.eup %2513 }
0x113d   :  { %v907_v19 = vadd.f32 1.0, %v2514_v18 }
0x113f   :  { %2515 = vrcp.f32 %v907_v19 }
0x114c   :  { %v2516_v20 = vpop.eup %2515 }
0x114d   :  { %v914_v24 = vmul.f32 %v2516_v20, %v912_v23 }
0x11ad   :  { %v917_v21 = vpop.permute.xlu0 %916 }
0x11ae   :  { %v919_v22 = vmul.f32 %v2516_v20, %v917_v21 }
0x11b0   :  { %921 = vrot.lane.b32.xlu1 %v919_v22, %s2663_s15 }
0x1222   :  { %v922_v25 = vpop.permute.xlu1 %921 }
0x1223   :  { %v924_v26 = vadd.f32 %v922_v25, %v914_v24 }
0x1225   :  { %2517 = vtanh.f32 %v924_v26 }
0x1232   :  { %v2518_v27 = vpop.eup %2517 }
0x1233   :  { %927 = vrot.lane.b32.xlu0 %v2518_v27, %s2662_s2 }
0x12a5   :  { %v928_v28 = vpop.permute.xlu0 %927 }
0x12a6   :  { %v930_v13 = vmul.f32 %v2516_v20, %v928_v28 }
0x12a8   :  { %v936_v29 = vrot.slane %v930_v13, 4 }
0x12aa   :  { %937 = vrot.lane.b32.xlu1 %v936_v29, %s2663_s15 }
0x131c   :  { %v938_v31 = vpop.permute.xlu1 %937 }
0x131d   :  { %2342 = vmatmul.mubr.msk.f32.vlgmr.msra.gmra.mxu0 %vm171_vm4, %v938_v31 }
0x131e   :  { %2363 = vmatprep.mubr.msk.f32.mxu0 %vm2661_vm0, %v2660_v1  ;;  %2356 = vmatpush3.msra.mxu0 %v2915_v51 }
0x131f   :  { %2357 = vmatprep.subr.mxu0 %v2660_v1 }
0x1320   :  { %2358 = vmatpush3.msra.mxu0 %v2921_v53 }
0x1321   :  { %2359 = vmatprep.subr.mxu0 %v2660_v1 }
0x13dd   :  { %v1007_v32 = vpop.f32.mrf.mxu0 }
0x13de   :  { %v1012_v33 = vrot.slane %v1007_v32, 2 }
0x13df   :  { %v2343_v34 = vpop.f32.mrf.mxu0 }
0x13e0   :  { %v1014_v35 = vadd.f32 %v1012_v33, %v2785_v11  ;;  %v1023_v11 = vrot.slane %v924_v26, 6 }
0x13e2   :  { %2519 = vtanh.f32 %v1014_v35  ;;  %v2134_v37 = vmul.f32 -1.442695, %v1014_v35 }
0x13e4   :  { %2521 = vpow2.f32 %v2134_v37 }
0x13ef   :  { %v2520_v36 = vpop.eup %2519 }
0x13f0   :  { %1027 = vrot.lane.b32.xlu0 %v2520_v36, %s2662_s2 }
0x13f1   :  { %v2522_v38 = vpop.eup %2521 }
0x13f2   :  { %v1018_v39 = vadd.f32 1.0, %v2522_v38 }
0x13f4   :  { %2523 = vrcp.f32 %v1018_v39 }
0x1401   :  { %v2524_v40 = vpop.eup %2523 }
0x1402   :  { %v1025_v43 = vmul.f32 %v2524_v40, %v1023_v11 }
0x1462   :  { %v1028_v41 = vpop.permute.xlu0 %1027 }
0x1463   :  { %v1030_v42 = vmul.f32 %v2524_v40, %v1028_v41 }
0x1465   :  { %1032 = vrot.lane.b32.xlu1 %v1030_v42, %s2663_s15 }
0x1469   :  { %380 = vrot.lane.b32.xlu1 %v2810_v48, %s2663_s15 }
0x146d   :  { %604 = vrot.lane.b32.xlu1 %v2848_v30, %s2663_s15 }
0x1471   :  { %932 = vrot.lane.b32.xlu1 %v930_v13, %s2663_s15 }
0x14d7   :  { %v1033_v44 = vpop.permute.xlu1 %1032 }
0x14d8   :  { %v1035_v45 = vadd.f32 %v1033_v44, %v1025_v43 }
0x14da   :  { %2525 = vtanh.f32 %v1035_v45 }
0x14db   :  { %v381_v46 = vpop.permute.xlu1 %380 }
0x14dc   :  { %384 = vst.msk [vmem:[#allocation2] sm:$0xc] %vm383_vm5, %v381_v46 }
0x14df   :  { %v605_v47 = vpop.permute.xlu1 %604 }
0x14e0   :  { %608 = vst.msk [vmem:[#allocation2] sm:$0xc0] %vm607_vm6, %v605_v47 }
0x14e3   :  { %v933_v48 = vpop.permute.xlu1 %932 }
0x14e4   :  { %935 = vst.msk [vmem:[#allocation2 + $0x8] sm:$0x30] %vm495_vm7, %v933_v48 }
0x14e7   :  { %v2526_v30 = vpop.eup %2525 }
0x14e8   :  { %1038 = vrot.lane.b32.xlu0 %v2526_v30, %s2662_s2 }
0x14ec   :  { %492 = vrot.lane.b32.xlu0 %v2829_v9, %s2663_s15  ;;  %v2927_v9 = vld [vmem:[%s3124_s5 + $0x8] sm:$0xff] }
0x14ed   :  { %2360 = vmatpush3.msra.mxu0 %v2927_v9 }
0x14ee   :  { %2361 = vmatprep.subr.mxu0 %v2660_v1 }
0x14ef   :  { %2362 = vmatpush3.msra.mxu0 %v2936_v54 }
0x14f0   :  { %821 = vrot.lane.b32.xlu0 %v2883_v2, %s2663_s15  ;;  %2364 = vmatmul.mubr.f32.vlgmr.msra.gmra.mxu0 %v2660_v1 }
0x14f1   :  { %2377 = vmatprep.subr.mxu0 %v2660_v1  ;;  %2385 = vmatprep.mubr.msk.f32.mxu0 %vm2661_vm0, %v2660_v1 }
0x14f2   :  { %2378 = vmatpush3.msra.mxu0 %v2915_v51 }
0x14f3   :  { %2379 = vmatprep.subr.mxu0 %v2660_v1 }
0x14f4   :  { %2380 = vmatpush3.msra.mxu0 %v2921_v53 }
0x14f5   :  { %2381 = vmatprep.subr.mxu0 %v2660_v1 }
0x14f6   :  { %2382 = vmatpush3.msra.mxu0 %v2927_v9 }
0x14f7   :  { %2383 = vmatprep.subr.mxu0 %v2660_v1 }
0x14f8   :  { %2384 = vmatpush3.msra.mxu0 %v2936_v54 }
0x14f9   :  { %2399 = vmatprep.subr.mxu0 %v2660_v1 }
0x155a   :  { %v1039_v55 = vpop.permute.xlu0 %1038 }
0x155b   :  { %v1041_v6 = vmul.f32 %v2524_v40, %v1039_v55 }
0x155d   :  { %1043 = vrot.lane.b32.xlu0 %v1041_v6, %s2663_s15 }
0x155e   :  { %v493_v56 = vpop.permute.xlu0 %492 }
0x155f   :  { %496 = vst.msk [vmem:[#allocation2] sm:$0x30] %vm495_vm7, %v493_v56 }
0x1562   :  { %v822_v57 = vpop.permute.xlu0 %821 }
0x1563   :  { %824 = vst.msk [vmem:[#allocation2 + $0x8] sm:$0xc] %vm383_vm5, %v822_v57 }
0x1566   :  { %v1047_v7 = vld [vmem:[#allocation2] sm:$0xff] }
0x1567   :  { %2352 = vmatprep.mubr.msk.f32.mxu1 %vm171_vm4, %v1047_v7 }
0x15b0   :  { %v1211_v8 = vpop.f32.mrf.mxu0 }
0x15b2   :  { %v2365_v60 = vpop.f32.mrf.mxu0 }
0x15cf   :  { %v1044_v58 = vpop.permute.xlu0 %1043 }
0x15d0   :  { %1046 = vst.msk [vmem:[#allocation2 + $0x8] sm:$0xc0] %vm607_vm6, %v1044_v58 }
0x15d7   :  { %v1048_v59 = vld [vmem:[#allocation2 + $0x8] sm:$0xff] }
0x15d8   :  { %2353 = vmatmul.mubr.msk.f32.vlgmr.msra.gmra.mxu1 %vm171_vm4, %v1048_v59 }
0x15d9   :  { %2367 = vmatpush3.msra.mxu1 %v2915_v51  ;;  %2374 = vmatprep.mubr.msk.f32.mxu1 %vm2661_vm0, %v2660_v1 }
0x15da   :  { %2368 = vmatprep.subr.mxu1 %v2660_v1 }
0x15db   :  { %2369 = vmatpush3.msra.mxu1 %v2921_v53 }
0x15dc   :  { %2370 = vmatprep.subr.mxu1 %v2660_v1 }
0x15dd   :  { %2371 = vmatpush3.msra.mxu1 %v2927_v9 }
0x15de   :  { %2372 = vmatprep.subr.mxu1 %v2660_v1 }
0x15df   :  { %2373 = vmatpush3.msra.mxu1 %v2936_v54 }
0x15e0   :  { %2388 = vmatprep.subr.mxu1 %v2660_v1 }
0x1698   :  { %v2354_v62 = vpop.f32.mrf.mxu1 }
0x1699   :  { %v2971_v63 = vadd.f32 %v2354_v62, %v2135_v61 }
0x169a   :  { %v1132_v0 = vpop.f32.mrf.mxu1 }
0x169b   :  { %v2973_v2 = vadd.f32 %v2135_v61, %v1132_v0 }
0x169d   :  { %v1215_v4 = vadd.f32 %v1211_v8, %v2973_v2 }
0x169f   :  { %2527 = vtanh.f32 %v1215_v4  ;;  %v2138_v10 = vmul.f32 -1.442695, %v1215_v4 }
0x16a1   :  { %2529 = vpow2.f32 %v2138_v10 }
0x16ac   :  { %v2528_v5 = vpop.eup %2527 }
0x16ad   :  { %1225 = vrot.lane.b32.xlu1 %v2528_v5, %s2662_s2 }
0x16ae   :  { %v2530_v12 = vpop.eup %2529 }
0x16af   :  { %v1219_v14 = vadd.f32 1.0, %v2530_v12 }
0x16b1   :  { %2531 = vrcp.f32 %v1219_v14 }
0x16be   :  { %v2532_v15 = vpop.eup %2531 }
0x16bf   :  { %v1223_v18 = vmul.f32 0.0, %v2532_v15 }
0x171f   :  { %v1226_v16 = vpop.permute.xlu1 %1225 }
0x1720   :  { %v1228_v17 = vmul.f32 %v2532_v15, %v1226_v16 }
0x1722   :  { %1230 = vrot.lane.b32.xlu0 %v1228_v17, %s2663_s15 }
0x1794   :  { %v1231_v19 = vpop.permute.xlu0 %1230 }
0x1795   :  { %v1233_v20 = vadd.f32 %v1231_v19, %v1223_v18 }
0x1797   :  { %2533 = vtanh.f32 %v1233_v20  ;;  %v1329_v36 = vrot.slane %v1233_v20, 6 }
0x17a4   :  { %v2534_v21 = vpop.eup %2533 }
0x17a5   :  { %1236 = vrot.lane.b32.xlu1 %v2534_v21, %s2662_s2 }
0x1817   :  { %v1237_v22 = vpop.permute.xlu1 %1236 }
0x1818   :  { %v1239_v23 = vmul.f32 %v2532_v15, %v1237_v22 }
0x181a   :  { %1241 = vrot.lane.b32.xlu0 %v1239_v23, %s2663_s15 }
0x188c   :  { %v1242_v24 = vpop.permute.xlu0 %1241 }
0x188d   :  { %1244 = vst.msk [vmem:[#allocation2] sm:$0x3] %vm274_vm3, %v1242_v24  ;;  %2375 = vmatmul.mubr.msk.f32.vlgmr.msra.gmra.mxu1 %vm171_vm4, %v1242_v24 }
0x188e   :  { %2389 = vmatpush3.msra.mxu1 %v2915_v51  ;;  %2396 = vmatprep.mubr.msk.f32.mxu1 %vm2661_vm0, %v2660_v1 }
0x188f   :  { %2390 = vmatprep.subr.mxu1 %v2660_v1 }
0x1890   :  { %2391 = vmatpush3.msra.mxu1 %v2921_v53 }
0x1891   :  { %2392 = vmatprep.subr.mxu1 %v2660_v1 }
0x1892   :  { %2393 = vmatpush3.msra.mxu1 %v2927_v9 }
0x1893   :  { %2394 = vmatprep.subr.mxu1 %v2660_v1 }
0x1894   :  { %2395 = vmatpush3.msra.mxu1 %v2936_v54 }
0x1895   :  { %2410 = vmatprep.subr.mxu1 %v2660_v1 }
0x194d   :  { %v1313_v25 = vpop.f32.mrf.mxu1 }
0x194e   :  { %v1318_v26 = vrot.slane %v1313_v25, 6 }
0x194f   :  { %v2376_v27 = vpop.f32.mrf.mxu1 }
0x1950   :  { %v1320_v28 = vadd.f32 %v1318_v26, %v2973_v2 }
0x1952   :  { %2535 = vtanh.f32 %v1320_v28  ;;  %v2140_v29 = vmul.f32 -1.442695, %v1320_v28 }
0x1954   :  { %2537 = vpow2.f32 %v2140_v29 }
0x195f   :  { %v2536_v13 = vpop.eup %2535 }
0x1960   :  { %1333 = vrot.lane.b32.xlu1 %v2536_v13, %s2662_s2 }
0x1961   :  { %v2538_v31 = vpop.eup %2537 }
0x1962   :  { %v1324_v32 = vadd.f32 1.0, %v2538_v31 }
0x1964   :  { %2539 = vrcp.f32 %v1324_v32 }
0x1971   :  { %v2540_v33 = vpop.eup %2539 }
0x1972   :  { %v1331_v37 = vmul.f32 %v2540_v33, %v1329_v36 }
0x19d2   :  { %v1334_v34 = vpop.permute.xlu1 %1333 }
0x19d3   :  { %v1336_v35 = vmul.f32 %v2540_v33, %v1334_v34 }
0x19d5   :  { %1338 = vrot.lane.b32.xlu0 %v1336_v35, %s2663_s15 }
0x1a47   :  { %v1339_v38 = vpop.permute.xlu0 %1338 }
0x1a48   :  { %v1341_v39 = vadd.f32 %v1339_v38, %v1331_v37 }
0x1a4a   :  { %2541 = vtanh.f32 %v1341_v39  ;;  %v1440_v6 = vrot.slane %v1341_v39, 6 }
0x1a57   :  { %v2542_v40 = vpop.eup %2541 }
0x1a58   :  { %1344 = vrot.lane.b32.xlu1 %v2542_v40, %s2662_s2 }
0x1aca   :  { %v1345_v41 = vpop.permute.xlu1 %1344 }
0x1acb   :  { %v2996_v42 = vmul.f32 %v2540_v33, %v1345_v41 }
0x1acd   :  { %v1353_v11 = vrot.slane %v2996_v42, 2 }
0x1acf   :  { %1354 = vrot.lane.b32.xlu0 %v1353_v11, %s2663_s15 }
0x1b41   :  { %v1355_v43 = vpop.permute.xlu0 %1354 }
0x1b42   :  { %2386 = vmatmul.mubr.msk.f32.vlgmr.msra.gmra.mxu0 %vm171_vm4, %v1355_v43 }
0x1b43   :  { %2400 = vmatpush3.msra.mxu0 %v2915_v51  ;;  %2407 = vmatprep.mubr.msk.f32.mxu0 %vm2661_vm0, %v2660_v1 }
0x1b44   :  { %2401 = vmatprep.subr.mxu0 %v2660_v1 }
0x1b45   :  { %2402 = vmatpush3.msra.mxu0 %v2921_v53 }
0x1b46   :  { %2403 = vmatprep.subr.mxu0 %v2660_v1 }
0x1b47   :  { %2404 = vmatpush3.msra.mxu0 %v2927_v9 }
0x1b48   :  { %2405 = vmatprep.subr.mxu0 %v2660_v1 }
0x1b49   :  { %2406 = vmatpush3.msra.mxu0 %v2936_v54 }
0x1b4a   :  { %2421 = vmatprep.subr.mxu0 %v2660_v1 }
0x1c02   :  { %v1424_v44 = vpop.f32.mrf.mxu0 }
0x1c03   :  { %v1429_v45 = vrot.slane %v1424_v44, 4 }
0x1c04   :  { %v2387_v46 = vpop.f32.mrf.mxu0 }
0x1c05   :  { %v1431_v47 = vadd.f32 %v1429_v45, %v2973_v2 }
0x1c07   :  { %2543 = vtanh.f32 %v1431_v47  ;;  %v2142_v30 = vmul.f32 -1.442695, %v1431_v47 }
0x1c09   :  { %2545 = vpow2.f32 %v2142_v30 }
0x1c14   :  { %v2544_v48 = vpop.eup %2543 }
0x1c15   :  { %1444 = vrot.lane.b32.xlu1 %v2544_v48, %s2662_s2 }
0x1c16   :  { %v2546_v49 = vpop.eup %2545 }
0x1c17   :  { %v1435_v50 = vadd.f32 1.0, %v2546_v49 }
0x1c19   :  { %2547 = vrcp.f32 %v1435_v50 }
0x1c26   :  { %v2548_v52 = vpop.eup %2547 }
0x1c27   :  { %v1442_v56 = vmul.f32 %v2548_v52, %v1440_v6 }
0x1c87   :  { %v1445_v3 = vpop.permute.xlu1 %1444 }
0x1c88   :  { %v1447_v55 = vmul.f32 %v2548_v52, %v1445_v3 }
0x1c8a   :  { %1449 = vrot.lane.b32.xlu0 %v1447_v55, %s2663_s15 }
0x1cfc   :  { %v1450_v57 = vpop.permute.xlu0 %1449 }
0x1cfd   :  { %v1452_v7 = vadd.f32 %v1450_v57, %v1442_v56 }
0x1cff   :  { %2549 = vtanh.f32 %v1452_v7  ;;  %v1551_v19 = vrot.slane %v1452_v7, 6 }
0x1d0c   :  { %v2550_v58 = vpop.eup %2549 }
0x1d0d   :  { %1455 = vrot.lane.b32.xlu1 %v2550_v58, %s2662_s2 }
0x1d7f   :  { %v1456_v59 = vpop.permute.xlu1 %1455 }
0x1d80   :  { %v3015_v8 = vmul.f32 %v2548_v52, %v1456_v59 }
0x1d82   :  { %v1464_v60 = vrot.slane %v3015_v8, 4 }
0x1d84   :  { %1465 = vrot.lane.b32.xlu0 %v1464_v60, %s2663_s15 }
0x1df6   :  { %v1466_v61 = vpop.permute.xlu0 %1465 }
0x1df7   :  { %2397 = vmatmul.mubr.msk.f32.vlgmr.msra.gmra.mxu1 %vm171_vm4, %v1466_v61 }
0x1df8   :  { %2411 = vmatpush3.msra.mxu1 %v2915_v51  ;;  %2418 = vmatprep.mubr.msk.f32.mxu1 %vm2661_vm0, %v2660_v1 }
0x1df9   :  { %2412 = vmatprep.subr.mxu1 %v2660_v1 }
0x1dfa   :  { %2413 = vmatpush3.msra.mxu1 %v2921_v53 }
0x1dfb   :  { %2414 = vmatprep.subr.mxu1 %v2660_v1 }
0x1dfc   :  { %2415 = vmatpush3.msra.mxu1 %v2927_v9 }
0x1dfd   :  { %2416 = vmatprep.subr.mxu1 %v2660_v1 }
0x1dfe   :  { %2417 = vmatpush3.msra.mxu1 %v2936_v54 }
0x1dff   :  { %2432 = vmatprep.subr.mxu1 %v2660_v1 }
0x1eb7   :  { %v1535_v62 = vpop.f32.mrf.mxu1 }
0x1eb8   :  { %v1540_v0 = vrot.slane %v1535_v62, 2 }
0x1eb9   :  { %v2398_v4 = vpop.f32.mrf.mxu1 }
0x1eba   :  { %v1542_v5 = vadd.f32 %v1540_v0, %v2973_v2 }
0x1ebc   :  { %2551 = vtanh.f32 %v1542_v5  ;;  %v2144_v12 = vmul.f32 -1.442695, %v1542_v5 }
0x1ebe   :  { %2553 = vpow2.f32 %v2144_v12 }
0x1ec9   :  { %v2552_v10 = vpop.eup %2551 }
0x1eca   :  { %1555 = vrot.lane.b32.xlu1 %v2552_v10, %s2662_s2 }
0x1ecb   :  { %v2554_v14 = vpop.eup %2553 }
0x1ecc   :  { %v1546_v15 = vadd.f32 1.0, %v2554_v14 }
0x1ece   :  { %2555 = vrcp.f32 %v1546_v15 }
0x1edb   :  { %v2556_v16 = vpop.eup %2555 }
0x1edc   :  { %v1553_v20 = vmul.f32 %v2556_v16, %v1551_v19 }
0x1f3c   :  { %v1556_v17 = vpop.permute.xlu1 %1555 }
0x1f3d   :  { %v1558_v18 = vmul.f32 %v2556_v16, %v1556_v17 }
0x1f3f   :  { %1560 = vrot.lane.b32.xlu0 %v1558_v18, %s2663_s15 }
0x1fb1   :  { %v1561_v21 = vpop.permute.xlu0 %1560 }
0x1fb2   :  { %v1563_v22 = vadd.f32 %v1561_v21, %v1553_v20 }
0x1fb4   :  { %2557 = vtanh.f32 %v1563_v22  ;;  %v1659_v37 = vrot.slane %v1563_v22, 6 }
0x1fc1   :  { %v2558_v2 = vpop.eup %2557 }
0x1fc2   :  { %1566 = vrot.lane.b32.xlu1 %v2558_v2, %s2662_s2 }
0x2034   :  { %v1567_v23 = vpop.permute.xlu1 %1566 }
0x2035   :  { %v3034_v24 = vmul.f32 %v2556_v16, %v1567_v23 }
0x2037   :  { %v1575_v25 = vrot.slane %v3034_v24, 6 }
0x2039   :  { %1576 = vrot.lane.b32.xlu0 %v1575_v25, %s2663_s15 }
0x20ab   :  { %v1577_v26 = vpop.permute.xlu0 %1576 }
0x20ac   :  { %2408 = vmatmul.mubr.msk.f32.vlgmr.msra.gmra.mxu0 %vm171_vm4, %v1577_v26 }
0x20ad   :  { %2422 = vmatpush3.msra.mxu0 %v2915_v51  ;;  %2429 = vmatprep.mubr.msk.f32.mxu0 %vm2661_vm0, %v2660_v1 }
0x20ae   :  { %2423 = vmatprep.subr.mxu0 %v2660_v1 }
0x20af   :  { %2424 = vmatpush3.msra.mxu0 %v2921_v53 }
0x20b0   :  { %2425 = vmatprep.subr.mxu0 %v2660_v1 }
0x20b1   :  { %2426 = vmatpush3.msra.mxu0 %v2927_v9 }
0x20b2   :  { %2427 = vmatprep.subr.mxu0 %v2660_v1 }
0x20b3   :  { %2428 = vmatpush3.msra.mxu0 %v2936_v54 }
0x216c   :  { %v1646_v27 = vpop.f32.mrf.mxu0 }
0x216d   :  { %v1650_v28 = vadd.f32 %v1646_v27, %v2971_v63 }
0x216e   :  { %v2409_v13 = vpop.f32.mrf.mxu0 }
0x216f   :  { %2559 = vtanh.f32 %v1650_v28  ;;  %v2146_v31 = vmul.f32 -1.442695, %v1650_v28 }
0x2171   :  { %2561 = vpow2.f32 %v2146_v31 }
0x217c   :  { %v2560_v29 = vpop.eup %2559 }
0x217d   :  { %1663 = vrot.lane.b32.xlu1 %v2560_v29, %s2662_s2 }
0x217e   :  { %v2562_v32 = vpop.eup %2561 }
0x217f   :  { %v1654_v33 = vadd.f32 1.0, %v2562_v32 }
0x2181   :  { %2563 = vrcp.f32 %v1654_v33 }
0x218e   :  { %v2564_v34 = vpop.eup %2563 }
0x218f   :  { %v1661_v38 = vmul.f32 %v2564_v34, %v1659_v37 }
0x21ef   :  { %v1664_v35 = vpop.permute.xlu1 %1663 }
0x21f0   :  { %v1666_v36 = vmul.f32 %v2564_v34, %v1664_v35 }
0x21f2   :  { %1668 = vrot.lane.b32.xlu0 %v1666_v36, %s2663_s15 }
0x2264   :  { %v1669_v39 = vpop.permute.xlu0 %1668 }
0x2265   :  { %v1671_v40 = vadd.f32 %v1669_v39, %v1661_v38 }
0x2267   :  { %2565 = vtanh.f32 %v1671_v40 }
0x2274   :  { %v2566_v41 = vpop.eup %2565 }
0x2275   :  { %1674 = vrot.lane.b32.xlu1 %v2566_v41, %s2662_s2 }
0x22e7   :  { %v1675_v11 = vpop.permute.xlu1 %1674 }
0x22e8   :  { %v1677_v43 = vmul.f32 %v2564_v34, %v1675_v11  ;;  %v2017_v11 = vld [vmem:[%s3126_s7 + $0x10] sm:$0xff] }
0x22ea   :  { %1679 = vrot.lane.b32.xlu0 %v1677_v43, %s2663_s15  ;;  %v2016_v43 = vld [vmem:[%s3126_s7 + $0x8] sm:$0xff] }
0x235c   :  { %v1680_v44 = vpop.permute.xlu0 %1679 }
0x235d   :  { %1682 = vst.msk [vmem:[#allocation2 + $0x8] sm:$0x3] %vm274_vm3, %v1680_v44  ;;  %2419 = vmatmul.mubr.msk.f32.vlgmr.msra.gmra.mxu1 %vm171_vm4, %v1680_v44 }
0x235e   :  { %2433 = vmatpush3.msra.mxu1 %v2915_v51  ;;  %2440 = vmatprep.mubr.msk.f32.mxu1 %vm2661_vm0, %v2660_v1 }
0x235f   :  { %2434 = vmatprep.subr.mxu1 %v2660_v1 }
0x2360   :  { %2435 = vmatpush3.msra.mxu1 %v2921_v53 }
0x2361   :  { %2436 = vmatprep.subr.mxu1 %v2660_v1 }
0x2362   :  { %2437 = vmatpush3.msra.mxu1 %v2927_v9 }
0x2363   :  { %2438 = vmatprep.subr.mxu1 %v2660_v1  ;;  %v1767_v1 = vrot.slane %v1671_v40, 6 }
0x2364   :  { %2439 = vmatpush3.msra.mxu1 %v2936_v54 }
0x241d   :  { %v1751_v45 = vpop.f32.mrf.mxu1 }
0x241e   :  { %v1756_v46 = vrot.slane %v1751_v45, 6 }
0x241f   :  { %v2420_v47 = vpop.f32.mrf.mxu1 }
0x2420   :  { %v1758_v51 = vadd.f32 %v1756_v46, %v2971_v63 }
0x2422   :  { %2567 = vtanh.f32 %v1758_v51  ;;  %v2148_v30 = vmul.f32 -1.442695, %v1758_v51 }
0x2424   :  { %2569 = vpow2.f32 %v2148_v30 }
0x242f   :  { %v2568_v48 = vpop.eup %2567 }
0x2430   :  { %1771 = vrot.lane.b32.xlu1 %v2568_v48, %s2662_s2 }
0x2431   :  { %v2570_v53 = vpop.eup %2569 }
0x2432   :  { %v1762_v49 = vadd.f32 1.0, %v2570_v53  ;;  %v2153_v53 = vld [vmem:[#allocation3] ss:$0 sm:$0xff] }
0x2434   :  { %2571 = vrcp.f32 %v1762_v49 }
0x2441   :  { %v2572_v50 = vpop.eup %2571 }
0x2442   :  { %v1769_v54 = vmul.f32 %v2572_v50, %v1767_v1 }
0x24a2   :  { %v1772_v9 = vpop.permute.xlu1 %1771 }
0x24a3   :  { %v1774_v52 = vmul.f32 %v2572_v50, %v1772_v9 }
0x24a5   :  { %1776 = vrot.lane.b32.xlu0 %v1774_v52, %s2663_s15 }
0x2517   :  { %v1777_v3 = vpop.permute.xlu0 %1776 }
0x2518   :  { %v1779_v55 = vadd.f32 %v1777_v3, %v1769_v54 }
0x251a   :  { %2573 = vtanh.f32 %v1779_v55  ;;  %v1878_v16 = vrot.slane %v1779_v55, 6 }
0x2527   :  { %v2574_v6 = vpop.eup %2573 }
0x2528   :  { %1782 = vrot.lane.b32.xlu1 %v2574_v6, %s2662_s2 }
0x259a   :  { %v1783_v56 = vpop.permute.xlu1 %1782 }
0x259b   :  { %v3068_v57 = vmul.f32 %v2572_v50, %v1783_v56 }
0x259d   :  { %v1791_v7 = vrot.slane %v3068_v57, 2 }
0x259f   :  { %1792 = vrot.lane.b32.xlu0 %v1791_v7, %s2663_s15 }
0x2611   :  { %v1793_v58 = vpop.permute.xlu0 %1792 }
0x2612   :  { %2430 = vmatmul.mubr.msk.f32.vlgmr.msra.gmra.mxu0 %vm171_vm4, %v1793_v58 }
0x26d2   :  { %v1862_v59 = vpop.f32.mrf.mxu0 }
0x26d3   :  { %v1867_v60 = vrot.slane %v1862_v59, 4 }
0x26d4   :  { %v2431_v61 = vpop.f32.mrf.mxu0 }
0x26d5   :  { %v1869_v62 = vadd.f32 %v1867_v60, %v2971_v63 }
0x26d7   :  { %2575 = vtanh.f32 %v1869_v62  ;;  %v2150_v4 = vmul.f32 -1.442695, %v1869_v62 }
0x26d9   :  { %2577 = vpow2.f32 %v2150_v4 }
0x26e4   :  { %v2576_v0 = vpop.eup %2575 }
0x26e5   :  { %1882 = vrot.lane.b32.xlu1 %v2576_v0, %s2662_s2 }
0x26e6   :  { %v2578_v5 = vpop.eup %2577 }
0x26e7   :  { %v1873_v10 = vadd.f32 1.0, %v2578_v5 }
0x26e9   :  { %2579 = vrcp.f32 %v1873_v10 }
0x26f6   :  { %v2580_v12 = vpop.eup %2579 }
0x26f7   :  { %v1880_v17 = vmul.f32 %v2580_v12, %v1878_v16 }
0x2757   :  { %v1883_v14 = vpop.permute.xlu1 %1882 }
0x2758   :  { %v1885_v15 = vmul.f32 %v2580_v12, %v1883_v14 }
0x275a   :  { %1887 = vrot.lane.b32.xlu0 %v1885_v15, %s2663_s15 }
0x27cc   :  { %v1888_v18 = vpop.permute.xlu0 %1887 }
0x27cd   :  { %v1890_v19 = vadd.f32 %v1888_v18, %v1880_v17 }
0x27cf   :  { %2581 = vtanh.f32 %v1890_v19 }
0x27dc   :  { %v2582_v20 = vpop.eup %2581 }
0x27dd   :  { %1893 = vrot.lane.b32.xlu1 %v2582_v20, %s2662_s2 }
0x284f   :  { %v1894_v21 = vpop.permute.xlu1 %1893 }
0x2850   :  { %v1896_v22 = vmul.f32 %v2580_v12, %v1894_v21 }
0x2852   :  { %v1902_v2 = vrot.slane %v1896_v22, 4 }
0x2854   :  { %1903 = vrot.lane.b32.xlu0 %v1902_v2, %s2663_s15 }
0x28c6   :  { %v1904_v23 = vpop.permute.xlu0 %1903 }
0x28c7   :  { %2441 = vmatmul.mubr.msk.f32.vlgmr.msra.gmra.mxu1 %vm171_vm4, %v1904_v23 }
0x2987   :  { %v1973_v25 = vpop.f32.mrf.mxu1 }
0x2988   :  { %v1978_v26 = vrot.slane %v1973_v25, 2 }
0x2989   :  { %v2442_v27 = vpop.f32.mrf.mxu1 }
0x298a   :  { %v1980_v28 = vadd.f32 %v1978_v26, %v2971_v63  ;;  %v1989_v63 = vrot.slane %v1890_v19, 6 }
0x298c   :  { %2583 = vtanh.f32 %v1980_v28  ;;  %v2152_v29 = vmul.f32 -1.442695, %v1980_v28 }
0x298e   :  { %2585 = vpow2.f32 %v2152_v29 }
0x2999   :  { %v2584_v13 = vpop.eup %2583 }
0x299a   :  { %1993 = vrot.lane.b32.xlu1 %v2584_v13, %s2662_s2 }
0x299b   :  { %v2586_v31 = vpop.eup %2585 }
0x299c   :  { %v1984_v32 = vadd.f32 1.0, %v2586_v31 }
0x299e   :  { %2587 = vrcp.f32 %v1984_v32 }
0x29ab   :  { %v2588_v33 = vpop.eup %2587 }
0x29ac   :  { %v1991_v36 = vmul.f32 %v2588_v33, %v1989_v63 }
0x2a0c   :  { %v1994_v34 = vpop.permute.xlu1 %1993 }
0x2a0d   :  { %v1996_v35 = vmul.f32 %v2588_v33, %v1994_v34 }
0x2a0f   :  { %1998 = vrot.lane.b32.xlu0 %v1996_v35, %s2663_s15 }
0x2a13   :  { %1349 = vrot.lane.b32.xlu0 %v2996_v42, %s2663_s15 }
0x2a17   :  { %1571 = vrot.lane.b32.xlu0 %v3034_v24, %s2663_s15  ;;  %v2018_v24 = vld [vmem:[%s3126_s7 + $0x18] sm:$0xff] }
0x2a18   :  { %2443 = vmatprep.subr.mxu0 %v2018_v24 }
0x2a19   :  { %2444 = vmatpush3.msra.mxu0 %v2018_v24 }
0x2a1a   :  { %2445 = vmatprep.subr.mxu0 %v2017_v11 }
0x2a1b   :  { %1898 = vrot.lane.b32.xlu0 %v1896_v22, %s2663_s15  ;;  %2446 = vmatpush3.msra.mxu0 %v2017_v11 }
0x2a1c   :  { %2447 = vmatprep.subr.mxu0 %v2016_v43 }
0x2a1d   :  { %2448 = vmatpush3.msra.mxu0 %v2016_v43 }
0x2a81   :  { %v1999_v37 = vpop.permute.xlu0 %1998 }
0x2a82   :  { %v2001_v38 = vadd.f32 %v1999_v37, %v1991_v36 }
0x2a84   :  { %2589 = vtanh.f32 %v2001_v38 }
0x2a85   :  { %v1350_v39 = vpop.permute.xlu0 %1349 }
0x2a86   :  { %1352 = vst.msk [vmem:[#allocation2] sm:$0xc] %vm383_vm5, %v1350_v39 }
0x2a89   :  { %v1572_v40 = vpop.permute.xlu0 %1571 }
0x2a8a   :  { %1574 = vst.msk [vmem:[#allocation2] sm:$0xc0] %vm607_vm6, %v1572_v40 }
0x2a8d   :  { %v1899_v41 = vpop.permute.xlu0 %1898 }
0x2a8e   :  { %1901 = vst.msk [vmem:[#allocation2 + $0x8] sm:$0x30] %vm495_vm7, %v1899_v41 }
0x2a91   :  { %v2590_v42 = vpop.eup %2589 }
0x2a92   :  { %2004 = vrot.lane.b32.xlu1 %v2590_v42, %s2662_s2 }
0x2a96   :  { %1460 = vrot.lane.b32.xlu1 %v3015_v8, %s2663_s15  ;;  %v2015_v8 = vld [vmem:[%s3126_s7] sm:$0xff] }
0x2a97   :  { %2449 = vmatprep.subr.mxu0 %v2015_v8 }
0x2a98   :  { %2450 = vmatpush3.msra.mxu0 %v2015_v8 }
0x2a9a   :  { %1787 = vrot.lane.b32.xlu1 %v3068_v57, %s2663_s15 }
0x2b04   :  { %v2005_v44 = vpop.permute.xlu1 %2004 }
0x2b05   :  { %v2007_v45 = vmul.f32 %v2588_v33, %v2005_v44 }
0x2b07   :  { %2009 = vrot.lane.b32.xlu1 %v2007_v45, %s2663_s15 }
0x2b08   :  { %v1461_v46 = vpop.permute.xlu1 %1460 }
0x2b09   :  { %1463 = vst.msk [vmem:[#allocation2] sm:$0x30] %vm495_vm7, %v1461_v46 }
0x2b0c   :  { %v1788_v47 = vpop.permute.xlu1 %1787 }
0x2b0d   :  { %1790 = vst.msk [vmem:[#allocation2 + $0x8] sm:$0xc] %vm383_vm5, %v1788_v47 }
0x2b10   :  { %v2013_v51 = vld [vmem:[#allocation2] sm:$0xff] }
0x2b11   :  { %2451 = vmatprep.mubr.msk.f32.mxu0 %vm171_vm4, %v2013_v51 }
0x2b79   :  { %v2010_v48 = vpop.permute.xlu1 %2009 }
0x2b7a   :  { %2012 = vst.msk [vmem:[#allocation2 + $0x8] sm:$0xc0] %vm607_vm6, %v2010_v48 }
0x2b81   :  { %v2014_v30 = vld [vmem:[#allocation2 + $0x8] sm:$0xff] }
0x2b82   :  { %2452 = vmatmul.mubr.msk.f32.vlgmr.msra.gmra.mxu0 %vm171_vm4, %v2014_v30 }
0x2c42   :  { %v2453_v49 = vpop.f32.mrf.mxu0 }
0x2c43   :  { %v2104_v50 = vadd.f32 %v2453_v49, %v2153_v53 }
0x2c44   :  { %v2098_v9 = vpop.f32.mrf.mxu0 }
0x2c45   :  { %2109 = vst.msk [vmem:[%s3128_s9 + $0x8] sm:$0xff] %vm2107_vm8, %v2104_v50  ;;  %v2099_v52 = vadd.f32 %v2153_v53, %v2098_v9 }
0x2c47   :  { %2108 = vst.msk [vmem:[%s3128_s9] sm:$0xff] %vm2107_vm8, %v2099_v52 }
0x2c48   :  { %2114 = vsyncpa [#allocation5], 1 }
0x2c49   :  { %2115 = vsyncpa [#allocation7], 1 }

</bundles_post_ra>
